<compile_context>
chip_gen: v7x
topology: tpu7x:2x2x1
jax: 0.10.0
libtpu: 0.0.40
codegen_flags: <defaults>
</compile_context>

<pallas_src>
import functools
import math

import jax
import jax.numpy as jnp
from jax import lax
from jax.experimental import pallas as pl
from jax.experimental.pallas import tpu as pltpu

VOCAB = 1000
VOCAB_PAD = 1024            # lane-dense LM-head width (multiple of 128)
D_MODEL = 64
NHEAD = 4
D_FF = 128
MAX_SEQ = 50
HEAD_DIM = D_MODEL // NHEAD
LN_EPS = 1e-5


def _layernorm(x, g, b):
    mu = jnp.mean(x, axis=-1, keepdims=True)
    var = jnp.mean((x - mu) ** 2, axis=-1, keepdims=True)
    return (x - mu) * lax.rsqrt(var + LN_EPS) * g + b


def transformer_kernel(h0_ref, pos_ref,
                       wqkv_ref, bqkv_ref, wout_ref, bout_ref,
                       ln1g_ref, ln1b_ref,
                       w1_ref, b1_ref, w2_ref, b2_ref,
                       ln2g_ref, ln2b_ref,
                       wfc_ref, bfc_ref,
                       out_ref,
                       qkv_scr, attn_scr,
                       *, seq_len):
    BT, S, _ = h0_ref.shape          # S = padded sequence length (multiple of 8)
    M = BT * S

    # embedding (pre-scaled by sqrt(d_model)) + positional encoding, flattened.
    # S % 8 == 0 -> the reshape is layout-free.
    h = (h0_ref[...] + pos_ref[...][None, :, :]).reshape(M, D_MODEL)       # f32

    # fused QKV projection across all BT*S rows (bf16 MXU, f32 accumulation).
    # 1/sqrt(head_dim) is pre-folded into the Q columns of wqkv/bqkv.
    qkv_scr[...] = jnp.dot(h.astype(jnp.bfloat16), wqkv_ref[...],
                           preferred_element_type=jnp.float32) + bqkv_ref[...]

    # additive mask for padded key columns (only materialized when S > seq_len)
    if seq_len < S:
        key_mask = jnp.where(
            lax.broadcasted_iota(jnp.int32, (1, S), 1) < seq_len,
            0.0, -1e30).astype(jnp.float32)
    else:
        key_mask = None

    # per-(batch, head) attention; the output projection is folded into the head
    # loop so per-head outputs never need a lane-axis concat; each batch writes
    # its rows of the VMEM scratch accumulator (no sublane concatenation).
    def batch_body(b, carry):
        r0 = pl.multiple_of(b * S, 8)
        qkv_b = qkv_scr[pl.ds(r0, S), :]                                    # (S, 3D)
        acc_b = jnp.zeros((S, D_MODEL), jnp.float32)
        for hh in range(NHEAD):
            lo = hh * HEAD_DIM
            qh = qkv_b[:, lo:lo + HEAD_DIM].astype(jnp.bfloat16)
            kh = qkv_b[:, D_MODEL + lo:D_MODEL + lo + HEAD_DIM].astype(jnp.bfloat16)
            vh = qkv_b[:, 2 * D_MODEL + lo:2 * D_MODEL + lo + HEAD_DIM].astype(jnp.bfloat16)
            s = lax.dot_general(qh, kh, (((1,), (1,)), ((), ())),
                                preferred_element_type=jnp.float32)         # (S, S)
            if key_mask is not None:
                s = s + key_mask
            s = s - jnp.max(s, axis=-1, keepdims=True)
            p = jnp.exp(s)
            p = p * pl.reciprocal(jnp.sum(p, axis=-1, keepdims=True), approx=True)
            ctx = jnp.dot(p.astype(jnp.bfloat16), vh,
                          preferred_element_type=jnp.float32)               # (S, hd)
            acc_b = acc_b + jnp.dot(ctx.astype(jnp.bfloat16),
                                    wout_ref[lo:lo + HEAD_DIM, :],
                                    preferred_element_type=jnp.float32)     # (S, D)
        attn_scr[pl.ds(r0, S), :] = acc_b
        return carry

    lax.fori_loop(0, BT, batch_body, 0, unroll=(BT <= 4))

    attn = attn_scr[...] + bout_ref[...]

    # post-norm residual 1 (f32 VPU math)
    x1 = _layernorm(h + attn, ln1g_ref[...], ln1b_ref[...])

    # feed-forward (ReLU), bf16 MXU / f32 accumulate
    ff = jnp.dot(x1.astype(jnp.bfloat16), w1_ref[...],
                 preferred_element_type=jnp.float32) + b1_ref[...]
    ff = jnp.maximum(ff, 0.0)
    ff = jnp.dot(ff.astype(jnp.bfloat16), w2_ref[...],
                 preferred_element_type=jnp.float32) + b2_ref[...]

    # post-norm residual 2
    x2 = _layernorm(x1 + ff, ln2g_ref[...], ln2b_ref[...])

    # LM head into lane-dense padded vocab (padded wfc columns / bfc entries are
    # zero, so logits columns >= VOCAB are exactly zero).
    logits = jnp.dot(x2.astype(jnp.bfloat16), wfc_ref[...],
                     preferred_element_type=jnp.float32) + bfc_ref[...]
    out_ref[...] = logits.reshape(BT, S, VOCAB_PAD).astype(out_ref.dtype)


def _tile_config(B, S_pad):
    """Generation-aware batch-tile size and VMEM limit."""
    try:
        dev = jax.devices()[0]
        kind = str(getattr(dev, "device_kind", "")).lower()
        n_tc = int(getattr(dev, "num_cores", 1) or 1)
    except Exception:                                    # pragma: no cover
        kind, n_tc = "", 1
    if ("v5" in kind or "v6" in kind) and "v7" not in kind:
        tile_cap, vmem_limit = 8 << 20, 64 << 20         # 128 MiB physical VMEM
    else:
        tile_cap, vmem_limit = 4 << 20, 40 << 20         # v7x / unknown: 64 MiB VMEM
    bytes_per_batch = S_pad * VOCAB_PAD * 4              # f32 logits rows per batch elem
    bt = max(1, min(B, tile_cap // bytes_per_batch))
    if n_tc >= 2 and B >= 2:
        bt = min(bt, max(1, B // 2))   # >= 2 grid steps so every TensorCore gets work
    return bt, vmem_limit


def prepare_params(params):
    """One-time weight preparation (hoisted out of the per-call path):
    bf16 casts, VOCAB->VOCAB_PAD padding, sqrt(d_model) folded into the
    embedding table, 1/sqrt(head_dim) folded into the Q projection columns."""
    bf16 = lambda a: a.astype(jnp.bfloat16)
    f32 = lambda a: a.astype(jnp.float32)
    q_scale = jnp.concatenate(
        [jnp.full((D_MODEL,), 1.0 / math.sqrt(HEAD_DIM), jnp.float32),
         jnp.ones((2 * D_MODEL,), jnp.float32)])
    wfc = jnp.pad(f32(params["wfc"]), ((0, 0), (0, VOCAB_PAD - VOCAB)))
    bfc = jnp.pad(f32(params["bfc"]), ((0, 0), (0, VOCAB_PAD - VOCAB)))
    return {
        "embedding_scaled": f32(params["embedding"]) * jnp.float32(math.sqrt(D_MODEL)),
        "pos": f32(params["pos"]),
        "wqkv": bf16(f32(params["wqkv"]) * q_scale[None, :]),
        "bqkv": f32(params["bqkv"]) * q_scale[None, :],
        "wout": bf16(params["wout"]), "bout": f32(params["bout"]),
        "ln1_g": f32(params["ln1_g"]), "ln1_b": f32(params["ln1_b"]),
        "w1": bf16(params["w1"]), "b1": f32(params["b1"]),
        "w2": bf16(params["w2"]), "b2": f32(params["b2"]),
        "ln2_g": f32(params["ln2_g"]), "ln2_b": f32(params["ln2_b"]),
        "wfc": bf16(wfc), "bfc": bfc,
    }


def transformer_llm_forward(tokens, prep, *, logits_dtype=jnp.float32):
    """tokens: (B, S) int32 -> padded logits (B_pad, S_pad, VOCAB_PAD).

    The valid region is [:B, :S, :VOCAB].  Padding is returned (not sliced off)
    so the dominant logits tensor is written to HBM exactly once; consumers
    should read the valid region in place or fuse the slice."""
    B, S = tokens.shape
    S_pad = ((S + 7) // 8) * 8

    # glue: data-dependent embedding gather stays outside the kernel
    h0 = prep["embedding_scaled"][tokens]                 # (B, S, D) f32, pre-scaled
    pos = prep["pos"][0, :S, :]                           # (S, D)
    if S_pad != S:
        h0 = jnp.pad(h0, ((0, 0), (0, S_pad - S), (0, 0)))
        pos = jnp.pad(pos, ((0, S_pad - S), (0, 0)))

    BT, vmem_limit = _tile_config(B, S_pad)
    B_pad = ((B + BT - 1) // BT) * BT
    if B_pad != B:
        h0 = jnp.pad(h0, ((0, B_pad - B), (0, 0), (0, 0)))
    num_tiles = B_pad // BT
    M = BT * S_pad

    weight_args = (prep["wqkv"], prep["bqkv"], prep["wout"], prep["bout"],
                   prep["ln1_g"], prep["ln1_b"],
                   prep["w1"], prep["b1"], prep["w2"], prep["b2"],
                   prep["ln2_g"], prep["ln2_b"],
                   prep["wfc"], prep["bfc"])

    const2d = lambda a: pl.BlockSpec(a.shape, lambda t: (0, 0))
    in_specs = ([pl.BlockSpec((BT, S_pad, D_MODEL), lambda t: (t, 0, 0)),
                 pl.BlockSpec((S_pad, D_MODEL), lambda t: (0, 0))]
                + [const2d(a) for a in weight_args])

    out = pl.pallas_call(
        functools.partial(transformer_kernel, seq_len=S),
        grid=(num_tiles,),
        in_specs=in_specs,
        out_specs=pl.BlockSpec((BT, S_pad, VOCAB_PAD), lambda t: (t, 0, 0)),
        out_shape=jax.ShapeDtypeStruct((B_pad, S_pad, VOCAB_PAD), logits_dtype),
        scratch_shapes=[pltpu.VMEM((M, 3 * D_MODEL), jnp.float32),
                        pltpu.VMEM((M, D_MODEL), jnp.float32)],
        compiler_params=pltpu.CompilerParams(
            dimension_semantics=("parallel",),
            vmem_limit_bytes=vmem_limit),
    )(h0, pos, *weight_args)
    return out


def make_params(key):
    ks = jax.random.split(key, 12)
    nrm = lambda k, shape, s=0.05: (s * jax.random.normal(k, shape)).astype(jnp.float32)
    return {
        "embedding": nrm(ks[0], (VOCAB, D_MODEL), 0.1),
        # nn.Parameter(torch.zeros(...)) in the module; random here so the add is exercised
        "pos": nrm(ks[1], (1, MAX_SEQ, D_MODEL), 0.02),
        "wqkv": nrm(ks[2], (D_MODEL, 3 * D_MODEL)),     # = in_proj_weight.T
        "bqkv": nrm(ks[3], (1, 3 * D_MODEL), 0.01),
        "wout": nrm(ks[4], (D_MODEL, D_MODEL)),         # = out_proj.weight.T
        "bout": nrm(ks[5], (1, D_MODEL), 0.01),
        "ln1_g": jnp.ones((1, D_MODEL), jnp.float32),
        "ln1_b": jnp.zeros((1, D_MODEL), jnp.float32),
        "w1": nrm(ks[6], (D_MODEL, D_FF)),              # = linear1.weight.T
        "b1": nrm(ks[7], (1, D_FF), 0.01),
        "w2": nrm(ks[8], (D_FF, D_MODEL)),              # = linear2.weight.T
        "b2": nrm(ks[9], (1, D_MODEL), 0.01),
        "ln2_g": jnp.ones((1, D_MODEL), jnp.float32),
        "ln2_b": jnp.zeros((1, D_MODEL), jnp.float32),
        "wfc": nrm(ks[10], (D_MODEL, VOCAB)),           # = fc.weight.T
        "bfc": nrm(ks[11], (1, VOCAB), 0.01),
    }


def reference_forward(tokens, p):
    """Pure-JAX f32 reference with identical semantics (for validation)."""
    B, S = tokens.shape
    h = p["embedding"][tokens] * math.sqrt(D_MODEL) + p["pos"][:, :S, :]
    qkv = h @ p["wqkv"] + p["bqkv"][0]
    q, k, v = qkv[..., :D_MODEL], qkv[..., D_MODEL:2 * D_MODEL], qkv[..., 2 * D_MODEL:]
    qh = q.reshape(B, S, NHEAD, HEAD_DIM).transpose(0, 2, 1, 3)
    kh = k.reshape(B, S, NHEAD, HEAD_DIM).transpose(0, 2, 1, 3)
    vh = v.reshape(B, S, NHEAD, HEAD_DIM).transpose(0, 2, 1, 3)
    s = jnp.einsum("bhqd,bhkd->bhqk", qh, kh) / math.sqrt(HEAD_DIM)
    a = jax.nn.softmax(s, axis=-1)
    o = jnp.einsum("bhqk,bhkd->bhqd", a, vh).transpose(0, 2, 1, 3).reshape(B, S, D_MODEL)
    o = o @ p["wout"] + p["bout"][0]

    def ln(x, g, b):
        mu = x.mean(-1, keepdims=True)
        var = ((x - mu) ** 2).mean(-1, keepdims=True)
        return (x - mu) / jnp.sqrt(var + LN_EPS) * g[0] + b[0]

    x1 = ln(h + o, p["ln1_g"], p["ln1_b"])
    ff = jnp.maximum(x1 @ p["w1"] + p["b1"][0], 0.0) @ p["w2"] + p["b2"][0]
    x2 = ln(x1 + ff, p["ln2_g"], p["ln2_b"])
    return x2 @ p["wfc"] + p["bfc"][0]


if __name__ == "__main__":
    key = jax.random.PRNGKey(0)
    pkey, tkey = jax.random.split(key)
    params = make_params(pkey)
    prep = prepare_params(params)   # one-time weight prep (hoisted out of per-call path)

    # (2, 8): aligned S.  (5, 16): batch padding + batch-fused path.
    # (3, 10): S % 8 != 0 -> sequence padding + padded-key masking path
    # (the shape regime a full S=50 run hits).
    for (B, S) in ((2, 8), (5, 16), (3, 10)):
        tkn_key = jax.random.fold_in(tkey, B * 100 + S)
        tokens = jax.random.randint(tkn_key, (B, S), 0, VOCAB, dtype=jnp.int32)

        padded = jax.block_until_ready(transformer_llm_forward(tokens, prep))
        S_pad = ((S + 7) // 8) * 8
        assert padded.shape[0] >= B and padded.shape[1:] == (S_pad, VOCAB_PAD)

        # slice only for validation against the f32 reference; production
        # consumers should read the valid region in place (no extra HBM copy).
        logits = padded[:B, :S, :VOCAB]
        ref = reference_forward(tokens, params)
        max_err = float(jnp.max(jnp.abs(logits - ref)))
        # tolerance covers bf16 weights + bf16 attention matmuls (f32 accum)
        # + approx reciprocal, validated against an all-f32 reference
        assert max_err < 5e-2, (B, S, max_err)

    print("KERNEL_OK")
</pallas_src>

<mosaic_0001>
module attributes {stable_mosaic.version = 11 : i64} {
  func.func @transformer_kernel(%arg0: i32, %arg1: memref<2x8x64xf32, #tpu.memory_space<vmem>>, %arg2: memref<8x64xf32, #tpu.memory_space<vmem>>, %arg3: memref<64x192xbf16, #tpu.memory_space<vmem>>, %arg4: memref<1x192xf32, #tpu.memory_space<vmem>>, %arg5: memref<64x64xbf16, #tpu.memory_space<vmem>>, %arg6: memref<1x64xf32, #tpu.memory_space<vmem>>, %arg7: memref<1x64xf32, #tpu.memory_space<vmem>>, %arg8: memref<1x64xf32, #tpu.memory_space<vmem>>, %arg9: memref<64x128xbf16, #tpu.memory_space<vmem>>, %arg10: memref<1x128xf32, #tpu.memory_space<vmem>>, %arg11: memref<128x64xbf16, #tpu.memory_space<vmem>>, %arg12: memref<1x64xf32, #tpu.memory_space<vmem>>, %arg13: memref<1x64xf32, #tpu.memory_space<vmem>>, %arg14: memref<1x64xf32, #tpu.memory_space<vmem>>, %arg15: memref<64x1024xbf16, #tpu.memory_space<vmem>>, %arg16: memref<1x1024xf32, #tpu.memory_space<vmem>>, %arg17: memref<2x8x1024xf32, #tpu.memory_space<vmem>>, %arg18: memref<16x192xf32, #tpu.memory_space<vmem>>, %arg19: memref<16x64xf32, #tpu.memory_space<vmem>>) attributes {dimension_semantics = [#tpu.dimension_semantics<parallel>], iteration_bounds = array<i64: 1>, scalar_prefetch = 0 : i64, scratch_operands = 2 : i64, tpu.core_type = #tpu.core_type<tc>, window_params = [{transform_indices = @transform_0, window_bounds = array<i64: 2, 8, 64>}, {pipeline_mode = #tpu.pipeline_mode<synchronous>, transform_indices = @transform_1, window_bounds = array<i64: 8, 64>}, {pipeline_mode = #tpu.pipeline_mode<synchronous>, transform_indices = @transform_2, window_bounds = array<i64: 64, 192>}, {pipeline_mode = #tpu.pipeline_mode<synchronous>, transform_indices = @transform_3, window_bounds = array<i64: 1, 192>}, {pipeline_mode = #tpu.pipeline_mode<synchronous>, transform_indices = @transform_4, window_bounds = array<i64: 64, 64>}, {pipeline_mode = #tpu.pipeline_mode<synchronous>, transform_indices = @transform_5, window_bounds = array<i64: 1, 64>}, {pipeline_mode = #tpu.pipeline_mode<synchronous>, transform_indices = @transform_6, window_bounds = array<i64: 1, 64>}, {pipeline_mode = #tpu.pipeline_mode<synchronous>, transform_indices = @transform_7, window_bounds = array<i64: 1, 64>}, {pipeline_mode = #tpu.pipeline_mode<synchronous>, transform_indices = @transform_8, window_bounds = array<i64: 64, 128>}, {pipeline_mode = #tpu.pipeline_mode<synchronous>, transform_indices = @transform_9, window_bounds = array<i64: 1, 128>}, {pipeline_mode = #tpu.pipeline_mode<synchronous>, transform_indices = @transform_10, window_bounds = array<i64: 128, 64>}, {pipeline_mode = #tpu.pipeline_mode<synchronous>, transform_indices = @transform_11, window_bounds = array<i64: 1, 64>}, {pipeline_mode = #tpu.pipeline_mode<synchronous>, transform_indices = @transform_12, window_bounds = array<i64: 1, 64>}, {pipeline_mode = #tpu.pipeline_mode<synchronous>, transform_indices = @transform_13, window_bounds = array<i64: 1, 64>}, {pipeline_mode = #tpu.pipeline_mode<synchronous>, transform_indices = @transform_14, window_bounds = array<i64: 64, 1024>}, {pipeline_mode = #tpu.pipeline_mode<synchronous>, transform_indices = @transform_15, window_bounds = array<i64: 1, 1024>}, {transform_indices = @transform_16, window_bounds = array<i64: 2, 8, 1024>}]} {
    %c0 = arith.constant 0 : index
    %c0_0 = arith.constant 0 : index
    %c0_1 = arith.constant 0 : index
    %0 = vector.load %arg1[%c0, %c0_0, %c0_1] : memref<2x8x64xf32, #tpu.memory_space<vmem>>, vector<2x8x64xf32>
    %c0_2 = arith.constant 0 : index
    %c0_3 = arith.constant 0 : index
    %1 = vector.load %arg2[%c0_2, %c0_3] : memref<8x64xf32, #tpu.memory_space<vmem>>, vector<8x64xf32>
    %2 = vector.shape_cast %1 : vector<8x64xf32> to vector<1x8x64xf32>
    %3 = vector.broadcast %2 : vector<1x8x64xf32> to vector<2x8x64xf32>
    %4 = arith.addf %0, %3 : vector<2x8x64xf32>
    %5 = vector.shape_cast %4 : vector<2x8x64xf32> to vector<16x64xf32>
    %6 = arith.truncf %5 : vector<16x64xf32> to vector<16x64xbf16>
    %c0_4 = arith.constant 0 : index
    %c0_5 = arith.constant 0 : index
    %7 = vector.load %arg3[%c0_4, %c0_5] : memref<64x192xbf16, #tpu.memory_space<vmem>>, vector<64x192xbf16>
    %cst = arith.constant dense<0.000000e+00> : vector<16x192xf32>
    %8 = tpu.matmul %6, %7, %cst {dimension_numbers = #tpu.dot_dimension_numbers<[1], [0], [0], [1], [0, 0, 1, 1], [], []>} : vector<16x64xbf16>, vector<64x192xbf16>, vector<16x192xf32> -> vector<16x192xf32>
    %c0_6 = arith.constant 0 : index
    %c0_7 = arith.constant 0 : index
    %9 = vector.load %arg4[%c0_6, %c0_7] : memref<1x192xf32, #tpu.memory_space<vmem>>, vector<1x192xf32>
    %10 = vector.broadcast %9 : vector<1x192xf32> to vector<16x192xf32>
    %11 = arith.addf %8, %10 : vector<16x192xf32>
    %c0_8 = arith.constant 0 : index
    %c0_9 = arith.constant 0 : index
    %12 = vector.load %arg18[%c0_8, %c0_9] : memref<16x192xf32, #tpu.memory_space<vmem>>, vector<16x192xf32>
    tpu.vector_store %arg18[%c0_8, %c0_9], %11 {strides = array<i32>} : memref<16x192xf32, #tpu.memory_space<vmem>>, vector<16x192xf32>,
    %c0_i32 = arith.constant 0 : i32
    %c8_i32 = arith.constant 8 : i32
    %13 = arith.muli %c0_i32, %c8_i32 : i32
    %14 = tpu.assume_multiple %13, 8 : i32
    %15 = arith.index_cast %14 : i32 to index
    %c0_10 = arith.constant 0 : index
    %16 = vector.load %arg18[%15, %c0_10] : memref<16x192xf32, #tpu.memory_space<vmem>>, vector<8x192xf32>
    %cst_11 = arith.constant 0.000000e+00 : f32
    %17 = vector.broadcast %cst_11 : f32 to vector<8x64xf32>
    %18 = vector.extract_strided_slice %16 {offsets = [0, 0], sizes = [8, 16], strides = [1, 1]} : vector<8x192xf32> to vector<8x16xf32>
    %19 = arith.truncf %18 : vector<8x16xf32> to vector<8x16xbf16>
    %20 = vector.extract_strided_slice %16 {offsets = [0, 64], sizes = [8, 16], strides = [1, 1]} : vector<8x192xf32> to vector<8x16xf32>
    %21 = arith.truncf %20 : vector<8x16xf32> to vector<8x16xbf16>
    %22 = vector.extract_strided_slice %16 {offsets = [0, 128], sizes = [8, 16], strides = [1, 1]} : vector<8x192xf32> to vector<8x16xf32>
    %23 = arith.truncf %22 : vector<8x16xf32> to vector<8x16xbf16>
    %cst_12 = arith.constant dense<0.000000e+00> : vector<8x8xf32>
    %24 = tpu.matmul %19, %21, %cst_12 {dimension_numbers = #tpu.dot_dimension_numbers<[1], [1], [0], [0], [0, 0, 1, 0], [], []>} : vector<8x16xbf16>, vector<8x16xbf16>, vector<8x8xf32> -> vector<8x8xf32>
    %cst_13 = arith.constant dense<0xFF800000> : vector<8xf32>
    %25 = vector.multi_reduction <maximumf>, %24, %cst_13 [1] : vector<8x8xf32> to vector<8xf32>
    %26 = vector.shape_cast %25 : vector<8xf32> to vector<8x1xf32>
    %27 = vector.broadcast %26 : vector<8x1xf32> to vector<8x8xf32>
    %28 = arith.subf %24, %27 : vector<8x8xf32>
    %29 = math.exp %28 : vector<8x8xf32>
    %cst_14 = arith.constant dense<0.000000e+00> : vector<8xf32>
    %30 = vector.multi_reduction <add>, %29, %cst_14 [1] : vector<8x8xf32> to vector<8xf32>
    %31 = vector.shape_cast %30 : vector<8xf32> to vector<8x1xf32>
    %32 = tpu.reciprocal %31 {approx = true} : vector<8x1xf32> -> vector<8x1xf32>
    %33 = vector.broadcast %32 : vector<8x1xf32> to vector<8x8xf32>
    %34 = arith.mulf %29, %33 : vector<8x8xf32>
    %35 = arith.truncf %34 : vector<8x8xf32> to vector<8x8xbf16>
    %cst_15 = arith.constant dense<0.000000e+00> : vector<8x16xf32>
    %36 = tpu.matmul %35, %23, %cst_15 {dimension_numbers = #tpu.dot_dimension_numbers<[1], [0], [0], [1], [0, 0, 1, 1], [], []>} : vector<8x8xbf16>, vector<8x16xbf16>, vector<8x16xf32> -> vector<8x16xf32>
    %37 = arith.truncf %36 : vector<8x16xf32> to vector<8x16xbf16>
    %c0_16 = arith.constant 0 : index
    %c0_17 = arith.constant 0 : index
    %38 = vector.load %arg5[%c0_16, %c0_17] : memref<64x64xbf16, #tpu.memory_space<vmem>>, vector<16x64xbf16>
    %cst_18 = arith.constant dense<0.000000e+00> : vector<8x64xf32>
    %39 = tpu.matmul %37, %38, %cst_18 {dimension_numbers = #tpu.dot_dimension_numbers<[1], [0], [0], [1], [0, 0, 1, 1], [], []>} : vector<8x16xbf16>, vector<16x64xbf16>, vector<8x64xf32> -> vector<8x64xf32>
    %40 = arith.addf %17, %39 : vector<8x64xf32>
    %41 = vector.extract_strided_slice %16 {offsets = [0, 16], sizes = [8, 16], strides = [1, 1]} : vector<8x192xf32> to vector<8x16xf32>
    %42 = arith.truncf %41 : vector<8x16xf32> to vector<8x16xbf16>
    %43 = vector.extract_strided_slice %16 {offsets = [0, 80], sizes = [8, 16], strides = [1, 1]} : vector<8x192xf32> to vector<8x16xf32>
    %44 = arith.truncf %43 : vector<8x16xf32> to vector<8x16xbf16>
    %45 = vector.extract_strided_slice %16 {offsets = [0, 144], sizes = [8, 16], strides = [1, 1]} : vector<8x192xf32> to vector<8x16xf32>
    %46 = arith.truncf %45 : vector<8x16xf32> to vector<8x16xbf16>
    %cst_19 = arith.constant dense<0.000000e+00> : vector<8x8xf32>
    %47 = tpu.matmul %42, %44, %cst_19 {dimension_numbers = #tpu.dot_dimension_numbers<[1], [1], [0], [0], [0, 0, 1, 0], [], []>} : vector<8x16xbf16>, vector<8x16xbf16>, vector<8x8xf32> -> vector<8x8xf32>
    %cst_20 = arith.constant dense<0xFF800000> : vector<8xf32>
    %48 = vector.multi_reduction <maximumf>, %47, %cst_20 [1] : vector<8x8xf32> to vector<8xf32>
    %49 = vector.shape_cast %48 : vector<8xf32> to vector<8x1xf32>
    %50 = vector.broadcast %49 : vector<8x1xf32> to vector<8x8xf32>
    %51 = arith.subf %47, %50 : vector<8x8xf32>
    %52 = math.exp %51 : vector<8x8xf32>
    %cst_21 = arith.constant dense<0.000000e+00> : vector<8xf32>
    %53 = vector.multi_reduction <add>, %52, %cst_21 [1] : vector<8x8xf32> to vector<8xf32>
    %54 = vector.shape_cast %53 : vector<8xf32> to vector<8x1xf32>
    %55 = tpu.reciprocal %54 {approx = true} : vector<8x1xf32> -> vector<8x1xf32>
    %56 = vector.broadcast %55 : vector<8x1xf32> to vector<8x8xf32>
    %57 = arith.mulf %52, %56 : vector<8x8xf32>
    %58 = arith.truncf %57 : vector<8x8xf32> to vector<8x8xbf16>
    %cst_22 = arith.constant dense<0.000000e+00> : vector<8x16xf32>
    %59 = tpu.matmul %58, %46, %cst_22 {dimension_numbers = #tpu.dot_dimension_numbers<[1], [0], [0], [1], [0, 0, 1, 1], [], []>} : vector<8x8xbf16>, vector<8x16xbf16>, vector<8x16xf32> -> vector<8x16xf32>
    %60 = arith.truncf %59 : vector<8x16xf32> to vector<8x16xbf16>
    %c16 = arith.constant 16 : index
    %c0_23 = arith.constant 0 : index
    %61 = vector.load %arg5[%c16, %c0_23] : memref<64x64xbf16, #tpu.memory_space<vmem>>, vector<16x64xbf16>
    %cst_24 = arith.constant dense<0.000000e+00> : vector<8x64xf32>
    %62 = tpu.matmul %60, %61, %cst_24 {dimension_numbers = #tpu.dot_dimension_numbers<[1], [0], [0], [1], [0, 0, 1, 1], [], []>} : vector<8x16xbf16>, vector<16x64xbf16>, vector<8x64xf32> -> vector<8x64xf32>
    %63 = arith.addf %40, %62 : vector<8x64xf32>
    %64 = vector.extract_strided_slice %16 {offsets = [0, 32], sizes = [8, 16], strides = [1, 1]} : vector<8x192xf32> to vector<8x16xf32>
    %65 = arith.truncf %64 : vector<8x16xf32> to vector<8x16xbf16>
    %66 = vector.extract_strided_slice %16 {offsets = [0, 96], sizes = [8, 16], strides = [1, 1]} : vector<8x192xf32> to vector<8x16xf32>
    %67 = arith.truncf %66 : vector<8x16xf32> to vector<8x16xbf16>
    %68 = vector.extract_strided_slice %16 {offsets = [0, 160], sizes = [8, 16], strides = [1, 1]} : vector<8x192xf32> to vector<8x16xf32>
    %69 = arith.truncf %68 : vector<8x16xf32> to vector<8x16xbf16>
    %cst_25 = arith.constant dense<0.000000e+00> : vector<8x8xf32>
    %70 = tpu.matmul %65, %67, %cst_25 {dimension_numbers = #tpu.dot_dimension_numbers<[1], [1], [0], [0], [0, 0, 1, 0], [], []>} : vector<8x16xbf16>, vector<8x16xbf16>, vector<8x8xf32> -> vector<8x8xf32>
    %cst_26 = arith.constant dense<0xFF800000> : vector<8xf32>
    %71 = vector.multi_reduction <maximumf>, %70, %cst_26 [1] : vector<8x8xf32> to vector<8xf32>
    %72 = vector.shape_cast %71 : vector<8xf32> to vector<8x1xf32>
    %73 = vector.broadcast %72 : vector<8x1xf32> to vector<8x8xf32>
    %74 = arith.subf %70, %73 : vector<8x8xf32>
    %75 = math.exp %74 : vector<8x8xf32>
    %cst_27 = arith.constant dense<0.000000e+00> : vector<8xf32>
    %76 = vector.multi_reduction <add>, %75, %cst_27 [1] : vector<8x8xf32> to vector<8xf32>
    %77 = vector.shape_cast %76 : vector<8xf32> to vector<8x1xf32>
    %78 = tpu.reciprocal %77 {approx = true} : vector<8x1xf32> -> vector<8x1xf32>
    %79 = vector.broadcast %78 : vector<8x1xf32> to vector<8x8xf32>
    %80 = arith.mulf %75, %79 : vector<8x8xf32>
    %81 = arith.truncf %80 : vector<8x8xf32> to vector<8x8xbf16>
    %cst_28 = arith.constant dense<0.000000e+00> : vector<8x16xf32>
    %82 = tpu.matmul %81, %69, %cst_28 {dimension_numbers = #tpu.dot_dimension_numbers<[1], [0], [0], [1], [0, 0, 1, 1], [], []>} : vector<8x8xbf16>, vector<8x16xbf16>, vector<8x16xf32> -> vector<8x16xf32>
    %83 = arith.truncf %82 : vector<8x16xf32> to vector<8x16xbf16>
    %c32 = arith.constant 32 : index
    %c0_29 = arith.constant 0 : index
    %84 = vector.load %arg5[%c32, %c0_29] : memref<64x64xbf16, #tpu.memory_space<vmem>>, vector<16x64xbf16>
    %cst_30 = arith.constant dense<0.000000e+00> : vector<8x64xf32>
    %85 = tpu.matmul %83, %84, %cst_30 {dimension_numbers = #tpu.dot_dimension_numbers<[1], [0], [0], [1], [0, 0, 1, 1], [], []>} : vector<8x16xbf16>, vector<16x64xbf16>, vector<8x64xf32> -> vector<8x64xf32>
    %86 = arith.addf %63, %85 : vector<8x64xf32>
    %87 = vector.extract_strided_slice %16 {offsets = [0, 48], sizes = [8, 16], strides = [1, 1]} : vector<8x192xf32> to vector<8x16xf32>
    %88 = arith.truncf %87 : vector<8x16xf32> to vector<8x16xbf16>
    %89 = vector.extract_strided_slice %16 {offsets = [0, 112], sizes = [8, 16], strides = [1, 1]} : vector<8x192xf32> to vector<8x16xf32>
    %90 = arith.truncf %89 : vector<8x16xf32> to vector<8x16xbf16>
    %91 = vector.extract_strided_slice %16 {offsets = [0, 176], sizes = [8, 16], strides = [1, 1]} : vector<8x192xf32> to vector<8x16xf32>
    %92 = arith.truncf %91 : vector<8x16xf32> to vector<8x16xbf16>
    %cst_31 = arith.constant dense<0.000000e+00> : vector<8x8xf32>
    %93 = tpu.matmul %88, %90, %cst_31 {dimension_numbers = #tpu.dot_dimension_numbers<[1], [1], [0], [0], [0, 0, 1, 0], [], []>} : vector<8x16xbf16>, vector<8x16xbf16>, vector<8x8xf32> -> vector<8x8xf32>
    %cst_32 = arith.constant dense<0xFF800000> : vector<8xf32>
    %94 = vector.multi_reduction <maximumf>, %93, %cst_32 [1] : vector<8x8xf32> to vector<8xf32>
    %95 = vector.shape_cast %94 : vector<8xf32> to vector<8x1xf32>
    %96 = vector.broadcast %95 : vector<8x1xf32> to vector<8x8xf32>
    %97 = arith.subf %93, %96 : vector<8x8xf32>
    %98 = math.exp %97 : vector<8x8xf32>
    %cst_33 = arith.constant dense<0.000000e+00> : vector<8xf32>
    %99 = vector.multi_reduction <add>, %98, %cst_33 [1] : vector<8x8xf32> to vector<8xf32>
    %100 = vector.shape_cast %99 : vector<8xf32> to vector<8x1xf32>
    %101 = tpu.reciprocal %100 {approx = true} : vector<8x1xf32> -> vector<8x1xf32>
    %102 = vector.broadcast %101 : vector<8x1xf32> to vector<8x8xf32>
    %103 = arith.mulf %98, %102 : vector<8x8xf32>
    %104 = arith.truncf %103 : vector<8x8xf32> to vector<8x8xbf16>
    %cst_34 = arith.constant dense<0.000000e+00> : vector<8x16xf32>
    %105 = tpu.matmul %104, %92, %cst_34 {dimension_numbers = #tpu.dot_dimension_numbers<[1], [0], [0], [1], [0, 0, 1, 1], [], []>} : vector<8x8xbf16>, vector<8x16xbf16>, vector<8x16xf32> -> vector<8x16xf32>
    %106 = arith.truncf %105 : vector<8x16xf32> to vector<8x16xbf16>
    %c48 = arith.constant 48 : index
    %c0_35 = arith.constant 0 : index
    %107 = vector.load %arg5[%c48, %c0_35] : memref<64x64xbf16, #tpu.memory_space<vmem>>, vector<16x64xbf16>
    %cst_36 = arith.constant dense<0.000000e+00> : vector<8x64xf32>
    %108 = tpu.matmul %106, %107, %cst_36 {dimension_numbers = #tpu.dot_dimension_numbers<[1], [0], [0], [1], [0, 0, 1, 1], [], []>} : vector<8x16xbf16>, vector<16x64xbf16>, vector<8x64xf32> -> vector<8x64xf32>
    %109 = arith.addf %86, %108 : vector<8x64xf32>
    %110 = arith.index_cast %14 : i32 to index
    %c0_37 = arith.constant 0 : index
    %111 = vector.load %arg19[%110, %c0_37] : memref<16x64xf32, #tpu.memory_space<vmem>>, vector<8x64xf32>
    tpu.vector_store %arg19[%110, %c0_37], %109 {strides = array<i32>} : memref<16x64xf32, #tpu.memory_space<vmem>>, vector<8x64xf32>,
    %c1_i32 = arith.constant 1 : i32
    %c8_i32_38 = arith.constant 8 : i32
    %112 = arith.muli %c1_i32, %c8_i32_38 : i32
    %113 = tpu.assume_multiple %112, 8 : i32
    %114 = arith.index_cast %113 : i32 to index
    %c0_39 = arith.constant 0 : index
    %115 = vector.load %arg18[%114, %c0_39] : memref<16x192xf32, #tpu.memory_space<vmem>>, vector<8x192xf32>
    %cst_40 = arith.constant 0.000000e+00 : f32
    %116 = vector.broadcast %cst_40 : f32 to vector<8x64xf32>
    %117 = vector.extract_strided_slice %115 {offsets = [0, 0], sizes = [8, 16], strides = [1, 1]} : vector<8x192xf32> to vector<8x16xf32>
    %118 = arith.truncf %117 : vector<8x16xf32> to vector<8x16xbf16>
    %119 = vector.extract_strided_slice %115 {offsets = [0, 64], sizes = [8, 16], strides = [1, 1]} : vector<8x192xf32> to vector<8x16xf32>
    %120 = arith.truncf %119 : vector<8x16xf32> to vector<8x16xbf16>
    %121 = vector.extract_strided_slice %115 {offsets = [0, 128], sizes = [8, 16], strides = [1, 1]} : vector<8x192xf32> to vector<8x16xf32>
    %122 = arith.truncf %121 : vector<8x16xf32> to vector<8x16xbf16>
    %cst_41 = arith.constant dense<0.000000e+00> : vector<8x8xf32>
    %123 = tpu.matmul %118, %120, %cst_41 {dimension_numbers = #tpu.dot_dimension_numbers<[1], [1], [0], [0], [0, 0, 1, 0], [], []>} : vector<8x16xbf16>, vector<8x16xbf16>, vector<8x8xf32> -> vector<8x8xf32>
    %cst_42 = arith.constant dense<0xFF800000> : vector<8xf32>
    %124 = vector.multi_reduction <maximumf>, %123, %cst_42 [1] : vector<8x8xf32> to vector<8xf32>
    %125 = vector.shape_cast %124 : vector<8xf32> to vector<8x1xf32>
    %126 = vector.broadcast %125 : vector<8x1xf32> to vector<8x8xf32>
    %127 = arith.subf %123, %126 : vector<8x8xf32>
    %128 = math.exp %127 : vector<8x8xf32>
    %cst_43 = arith.constant dense<0.000000e+00> : vector<8xf32>
    %129 = vector.multi_reduction <add>, %128, %cst_43 [1] : vector<8x8xf32> to vector<8xf32>
    %130 = vector.shape_cast %129 : vector<8xf32> to vector<8x1xf32>
    %131 = tpu.reciprocal %130 {approx = true} : vector<8x1xf32> -> vector<8x1xf32>
    %132 = vector.broadcast %131 : vector<8x1xf32> to vector<8x8xf32>
    %133 = arith.mulf %128, %132 : vector<8x8xf32>
    %134 = arith.truncf %133 : vector<8x8xf32> to vector<8x8xbf16>
    %cst_44 = arith.constant dense<0.000000e+00> : vector<8x16xf32>
    %135 = tpu.matmul %134, %122, %cst_44 {dimension_numbers = #tpu.dot_dimension_numbers<[1], [0], [0], [1], [0, 0, 1, 1], [], []>} : vector<8x8xbf16>, vector<8x16xbf16>, vector<8x16xf32> -> vector<8x16xf32>
    %136 = arith.truncf %135 : vector<8x16xf32> to vector<8x16xbf16>
    %c0_45 = arith.constant 0 : index
    %c0_46 = arith.constant 0 : index
    %137 = vector.load %arg5[%c0_45, %c0_46] : memref<64x64xbf16, #tpu.memory_space<vmem>>, vector<16x64xbf16>
    %cst_47 = arith.constant dense<0.000000e+00> : vector<8x64xf32>
    %138 = tpu.matmul %136, %137, %cst_47 {dimension_numbers = #tpu.dot_dimension_numbers<[1], [0], [0], [1], [0, 0, 1, 1], [], []>} : vector<8x16xbf16>, vector<16x64xbf16>, vector<8x64xf32> -> vector<8x64xf32>
    %139 = arith.addf %116, %138 : vector<8x64xf32>
    %140 = vector.extract_strided_slice %115 {offsets = [0, 16], sizes = [8, 16], strides = [1, 1]} : vector<8x192xf32> to vector<8x16xf32>
    %141 = arith.truncf %140 : vector<8x16xf32> to vector<8x16xbf16>
    %142 = vector.extract_strided_slice %115 {offsets = [0, 80], sizes = [8, 16], strides = [1, 1]} : vector<8x192xf32> to vector<8x16xf32>
    %143 = arith.truncf %142 : vector<8x16xf32> to vector<8x16xbf16>
    %144 = vector.extract_strided_slice %115 {offsets = [0, 144], sizes = [8, 16], strides = [1, 1]} : vector<8x192xf32> to vector<8x16xf32>
    %145 = arith.truncf %144 : vector<8x16xf32> to vector<8x16xbf16>
    %cst_48 = arith.constant dense<0.000000e+00> : vector<8x8xf32>
    %146 = tpu.matmul %141, %143, %cst_48 {dimension_numbers = #tpu.dot_dimension_numbers<[1], [1], [0], [0], [0, 0, 1, 0], [], []>} : vector<8x16xbf16>, vector<8x16xbf16>, vector<8x8xf32> -> vector<8x8xf32>
    %cst_49 = arith.constant dense<0xFF800000> : vector<8xf32>
    %147 = vector.multi_reduction <maximumf>, %146, %cst_49 [1] : vector<8x8xf32> to vector<8xf32>
    %148 = vector.shape_cast %147 : vector<8xf32> to vector<8x1xf32>
    %149 = vector.broadcast %148 : vector<8x1xf32> to vector<8x8xf32>
    %150 = arith.subf %146, %149 : vector<8x8xf32>
    %151 = math.exp %150 : vector<8x8xf32>
    %cst_50 = arith.constant dense<0.000000e+00> : vector<8xf32>
    %152 = vector.multi_reduction <add>, %151, %cst_50 [1] : vector<8x8xf32> to vector<8xf32>
    %153 = vector.shape_cast %152 : vector<8xf32> to vector<8x1xf32>
    %154 = tpu.reciprocal %153 {approx = true} : vector<8x1xf32> -> vector<8x1xf32>
    %155 = vector.broadcast %154 : vector<8x1xf32> to vector<8x8xf32>
    %156 = arith.mulf %151, %155 : vector<8x8xf32>
    %157 = arith.truncf %156 : vector<8x8xf32> to vector<8x8xbf16>
    %cst_51 = arith.constant dense<0.000000e+00> : vector<8x16xf32>
    %158 = tpu.matmul %157, %145, %cst_51 {dimension_numbers = #tpu.dot_dimension_numbers<[1], [0], [0], [1], [0, 0, 1, 1], [], []>} : vector<8x8xbf16>, vector<8x16xbf16>, vector<8x16xf32> -> vector<8x16xf32>
    %159 = arith.truncf %158 : vector<8x16xf32> to vector<8x16xbf16>
    %c16_52 = arith.constant 16 : index
    %c0_53 = arith.constant 0 : index
    %160 = vector.load %arg5[%c16_52, %c0_53] : memref<64x64xbf16, #tpu.memory_space<vmem>>, vector<16x64xbf16>
    %cst_54 = arith.constant dense<0.000000e+00> : vector<8x64xf32>
    %161 = tpu.matmul %159, %160, %cst_54 {dimension_numbers = #tpu.dot_dimension_numbers<[1], [0], [0], [1], [0, 0, 1, 1], [], []>} : vector<8x16xbf16>, vector<16x64xbf16>, vector<8x64xf32> -> vector<8x64xf32>
    %162 = arith.addf %139, %161 : vector<8x64xf32>
    %163 = vector.extract_strided_slice %115 {offsets = [0, 32], sizes = [8, 16], strides = [1, 1]} : vector<8x192xf32> to vector<8x16xf32>
    %164 = arith.truncf %163 : vector<8x16xf32> to vector<8x16xbf16>
    %165 = vector.extract_strided_slice %115 {offsets = [0, 96], sizes = [8, 16], strides = [1, 1]} : vector<8x192xf32> to vector<8x16xf32>
    %166 = arith.truncf %165 : vector<8x16xf32> to vector<8x16xbf16>
    %167 = vector.extract_strided_slice %115 {offsets = [0, 160], sizes = [8, 16], strides = [1, 1]} : vector<8x192xf32> to vector<8x16xf32>
    %168 = arith.truncf %167 : vector<8x16xf32> to vector<8x16xbf16>
    %cst_55 = arith.constant dense<0.000000e+00> : vector<8x8xf32>
    %169 = tpu.matmul %164, %166, %cst_55 {dimension_numbers = #tpu.dot_dimension_numbers<[1], [1], [0], [0], [0, 0, 1, 0], [], []>} : vector<8x16xbf16>, vector<8x16xbf16>, vector<8x8xf32> -> vector<8x8xf32>
    %cst_56 = arith.constant dense<0xFF800000> : vector<8xf32>
    %170 = vector.multi_reduction <maximumf>, %169, %cst_56 [1] : vector<8x8xf32> to vector<8xf32>
    %171 = vector.shape_cast %170 : vector<8xf32> to vector<8x1xf32>
    %172 = vector.broadcast %171 : vector<8x1xf32> to vector<8x8xf32>
    %173 = arith.subf %169, %172 : vector<8x8xf32>
    %174 = math.exp %173 : vector<8x8xf32>
    %cst_57 = arith.constant dense<0.000000e+00> : vector<8xf32>
    %175 = vector.multi_reduction <add>, %174, %cst_57 [1] : vector<8x8xf32> to vector<8xf32>
    %176 = vector.shape_cast %175 : vector<8xf32> to vector<8x1xf32>
    %177 = tpu.reciprocal %176 {approx = true} : vector<8x1xf32> -> vector<8x1xf32>
    %178 = vector.broadcast %177 : vector<8x1xf32> to vector<8x8xf32>
    %179 = arith.mulf %174, %178 : vector<8x8xf32>
    %180 = arith.truncf %179 : vector<8x8xf32> to vector<8x8xbf16>
    %cst_58 = arith.constant dense<0.000000e+00> : vector<8x16xf32>
    %181 = tpu.matmul %180, %168, %cst_58 {dimension_numbers = #tpu.dot_dimension_numbers<[1], [0], [0], [1], [0, 0, 1, 1], [], []>} : vector<8x8xbf16>, vector<8x16xbf16>, vector<8x16xf32> -> vector<8x16xf32>
    %182 = arith.truncf %181 : vector<8x16xf32> to vector<8x16xbf16>
    %c32_59 = arith.constant 32 : index
    %c0_60 = arith.constant 0 : index
    %183 = vector.load %arg5[%c32_59, %c0_60] : memref<64x64xbf16, #tpu.memory_space<vmem>>, vector<16x64xbf16>
    %cst_61 = arith.constant dense<0.000000e+00> : vector<8x64xf32>
    %184 = tpu.matmul %182, %183, %cst_61 {dimension_numbers = #tpu.dot_dimension_numbers<[1], [0], [0], [1], [0, 0, 1, 1], [], []>} : vector<8x16xbf16>, vector<16x64xbf16>, vector<8x64xf32> -> vector<8x64xf32>
    %185 = arith.addf %162, %184 : vector<8x64xf32>
    %186 = vector.extract_strided_slice %115 {offsets = [0, 48], sizes = [8, 16], strides = [1, 1]} : vector<8x192xf32> to vector<8x16xf32>
    %187 = arith.truncf %186 : vector<8x16xf32> to vector<8x16xbf16>
    %188 = vector.extract_strided_slice %115 {offsets = [0, 112], sizes = [8, 16], strides = [1, 1]} : vector<8x192xf32> to vector<8x16xf32>
    %189 = arith.truncf %188 : vector<8x16xf32> to vector<8x16xbf16>
    %190 = vector.extract_strided_slice %115 {offsets = [0, 176], sizes = [8, 16], strides = [1, 1]} : vector<8x192xf32> to vector<8x16xf32>
    %191 = arith.truncf %190 : vector<8x16xf32> to vector<8x16xbf16>
    %cst_62 = arith.constant dense<0.000000e+00> : vector<8x8xf32>
    %192 = tpu.matmul %187, %189, %cst_62 {dimension_numbers = #tpu.dot_dimension_numbers<[1], [1], [0], [0], [0, 0, 1, 0], [], []>} : vector<8x16xbf16>, vector<8x16xbf16>, vector<8x8xf32> -> vector<8x8xf32>
    %cst_63 = arith.constant dense<0xFF800000> : vector<8xf32>
    %193 = vector.multi_reduction <maximumf>, %192, %cst_63 [1] : vector<8x8xf32> to vector<8xf32>
    %194 = vector.shape_cast %193 : vector<8xf32> to vector<8x1xf32>
    %195 = vector.broadcast %194 : vector<8x1xf32> to vector<8x8xf32>
    %196 = arith.subf %192, %195 : vector<8x8xf32>
    %197 = math.exp %196 : vector<8x8xf32>
    %cst_64 = arith.constant dense<0.000000e+00> : vector<8xf32>
    %198 = vector.multi_reduction <add>, %197, %cst_64 [1] : vector<8x8xf32> to vector<8xf32>
    %199 = vector.shape_cast %198 : vector<8xf32> to vector<8x1xf32>
    %200 = tpu.reciprocal %199 {approx = true} : vector<8x1xf32> -> vector<8x1xf32>
    %201 = vector.broadcast %200 : vector<8x1xf32> to vector<8x8xf32>
    %202 = arith.mulf %197, %201 : vector<8x8xf32>
    %203 = arith.truncf %202 : vector<8x8xf32> to vector<8x8xbf16>
    %cst_65 = arith.constant dense<0.000000e+00> : vector<8x16xf32>
    %204 = tpu.matmul %203, %191, %cst_65 {dimension_numbers = #tpu.dot_dimension_numbers<[1], [0], [0], [1], [0, 0, 1, 1], [], []>} : vector<8x8xbf16>, vector<8x16xbf16>, vector<8x16xf32> -> vector<8x16xf32>
    %205 = arith.truncf %204 : vector<8x16xf32> to vector<8x16xbf16>
    %c48_66 = arith.constant 48 : index
    %c0_67 = arith.constant 0 : index
    %206 = vector.load %arg5[%c48_66, %c0_67] : memref<64x64xbf16, #tpu.memory_space<vmem>>, vector<16x64xbf16>
    %cst_68 = arith.constant dense<0.000000e+00> : vector<8x64xf32>
    %207 = tpu.matmul %205, %206, %cst_68 {dimension_numbers = #tpu.dot_dimension_numbers<[1], [0], [0], [1], [0, 0, 1, 1], [], []>} : vector<8x16xbf16>, vector<16x64xbf16>, vector<8x64xf32> -> vector<8x64xf32>
    %208 = arith.addf %185, %207 : vector<8x64xf32>
    %209 = arith.index_cast %113 : i32 to index
    %c0_69 = arith.constant 0 : index
    %210 = vector.load %arg19[%209, %c0_69] : memref<16x64xf32, #tpu.memory_space<vmem>>, vector<8x64xf32>
    tpu.vector_store %arg19[%209, %c0_69], %208 {strides = array<i32>} : memref<16x64xf32, #tpu.memory_space<vmem>>, vector<8x64xf32>,
    %c2_i32 = arith.constant 2 : i32
    %c0_70 = arith.constant 0 : index
    %c0_71 = arith.constant 0 : index
    %211 = vector.load %arg19[%c0_70, %c0_71] : memref<16x64xf32, #tpu.memory_space<vmem>>, vector<16x64xf32>
    %c0_72 = arith.constant 0 : index
    %c0_73 = arith.constant 0 : index
    %212 = vector.load %arg6[%c0_72, %c0_73] : memref<1x64xf32, #tpu.memory_space<vmem>>, vector<1x64xf32>
    %213 = vector.broadcast %212 : vector<1x64xf32> to vector<16x64xf32>
    %214 = arith.addf %211, %213 : vector<16x64xf32>
    %215 = arith.addf %5, %214 : vector<16x64xf32>
    %c0_74 = arith.constant 0 : index
    %c0_75 = arith.constant 0 : index
    %216 = vector.load %arg7[%c0_74, %c0_75] : memref<1x64xf32, #tpu.memory_space<vmem>>, vector<1x64xf32>
    %c0_76 = arith.constant 0 : index
    %c0_77 = arith.constant 0 : index
    %217 = vector.load %arg8[%c0_76, %c0_77] : memref<1x64xf32, #tpu.memory_space<vmem>>, vector<1x64xf32>
    %cst_78 = arith.constant dense<0.000000e+00> : vector<16xf32>
    %218 = vector.multi_reduction <add>, %215, %cst_78 [1] : vector<16x64xf32> to vector<16xf32>
    %219 = vector.shape_cast %218 : vector<16xf32> to vector<16x1xf32>
    %cst_79 = arith.constant 6.400000e+01 : f32
    %220 = vector.broadcast %cst_79 : f32 to vector<16x1xf32>
    %221 = arith.divf %219, %220 : vector<16x1xf32>
    %222 = vector.broadcast %221 : vector<16x1xf32> to vector<16x64xf32>
    %223 = arith.subf %215, %222 : vector<16x64xf32>
    %224 = arith.mulf %223, %223 : vector<16x64xf32>
    %cst_80 = arith.constant dense<0.000000e+00> : vector<16xf32>
    %225 = vector.multi_reduction <add>, %224, %cst_80 [1] : vector<16x64xf32> to vector<16xf32>
    %226 = vector.shape_cast %225 : vector<16xf32> to vector<16x1xf32>
    %cst_81 = arith.constant 6.400000e+01 : f32
    %227 = vector.broadcast %cst_81 : f32 to vector<16x1xf32>
    %228 = arith.divf %226, %227 : vector<16x1xf32>
    %229 = vector.broadcast %221 : vector<16x1xf32> to vector<16x64xf32>
    %230 = arith.subf %215, %229 : vector<16x64xf32>
    %cst_82 = arith.constant 9.99999974E-6 : f32
    %231 = vector.broadcast %cst_82 : f32 to vector<16x1xf32>
    %232 = arith.addf %228, %231 : vector<16x1xf32>
    %233 = math.rsqrt %232 : vector<16x1xf32>
    %234 = vector.broadcast %233 : vector<16x1xf32> to vector<16x64xf32>
    %235 = arith.mulf %230, %234 : vector<16x64xf32>
    %236 = vector.broadcast %216 : vector<1x64xf32> to vector<16x64xf32>
    %237 = arith.mulf %235, %236 : vector<16x64xf32>
    %238 = vector.broadcast %217 : vector<1x64xf32> to vector<16x64xf32>
    %239 = arith.addf %237, %238 : vector<16x64xf32>
    %240 = arith.truncf %239 : vector<16x64xf32> to vector<16x64xbf16>
    %c0_83 = arith.constant 0 : index
    %c0_84 = arith.constant 0 : index
    %241 = vector.load %arg9[%c0_83, %c0_84] : memref<64x128xbf16, #tpu.memory_space<vmem>>, vector<64x128xbf16>
    %cst_85 = arith.constant dense<0.000000e+00> : vector<16x128xf32>
    %242 = tpu.matmul %240, %241, %cst_85 {dimension_numbers = #tpu.dot_dimension_numbers<[1], [0], [0], [1], [0, 0, 1, 1], [], []>} : vector<16x64xbf16>, vector<64x128xbf16>, vector<16x128xf32> -> vector<16x128xf32>
    %c0_86 = arith.constant 0 : index
    %c0_87 = arith.constant 0 : index
    %243 = vector.load %arg10[%c0_86, %c0_87] : memref<1x128xf32, #tpu.memory_space<vmem>>, vector<1x128xf32>
    %244 = vector.broadcast %243 : vector<1x128xf32> to vector<16x128xf32>
    %245 = arith.addf %242, %244 : vector<16x128xf32>
    %cst_88 = arith.constant 0.000000e+00 : f32
    %246 = vector.broadcast %cst_88 : f32 to vector<16x128xf32>
    %247 = arith.maximumf %245, %246 : vector<16x128xf32>
    %248 = arith.truncf %247 : vector<16x128xf32> to vector<16x128xbf16>
    %c0_89 = arith.constant 0 : index
    %c0_90 = arith.constant 0 : index
    %249 = vector.load %arg11[%c0_89, %c0_90] : memref<128x64xbf16, #tpu.memory_space<vmem>>, vector<128x64xbf16>
    %cst_91 = arith.constant dense<0.000000e+00> : vector<16x64xf32>
    %250 = tpu.matmul %248, %249, %cst_91 {dimension_numbers = #tpu.dot_dimension_numbers<[1], [0], [0], [1], [0, 0, 1, 1], [], []>} : vector<16x128xbf16>, vector<128x64xbf16>, vector<16x64xf32> -> vector<16x64xf32>
    %c0_92 = arith.constant 0 : index
    %c0_93 = arith.constant 0 : index
    %251 = vector.load %arg12[%c0_92, %c0_93] : memref<1x64xf32, #tpu.memory_space<vmem>>, vector<1x64xf32>
    %252 = vector.broadcast %251 : vector<1x64xf32> to vector<16x64xf32>
    %253 = arith.addf %250, %252 : vector<16x64xf32>
    %254 = arith.addf %239, %253 : vector<16x64xf32>
    %c0_94 = arith.constant 0 : index
    %c0_95 = arith.constant 0 : index
    %255 = vector.load %arg13[%c0_94, %c0_95] : memref<1x64xf32, #tpu.memory_space<vmem>>, vector<1x64xf32>
    %c0_96 = arith.constant 0 : index
    %c0_97 = arith.constant 0 : index
    %256 = vector.load %arg14[%c0_96, %c0_97] : memref<1x64xf32, #tpu.memory_space<vmem>>, vector<1x64xf32>
    %cst_98 = arith.constant dense<0.000000e+00> : vector<16xf32>
    %257 = vector.multi_reduction <add>, %254, %cst_98 [1] : vector<16x64xf32> to vector<16xf32>
    %258 = vector.shape_cast %257 : vector<16xf32> to vector<16x1xf32>
    %cst_99 = arith.constant 6.400000e+01 : f32
    %259 = vector.broadcast %cst_99 : f32 to vector<16x1xf32>
    %260 = arith.divf %258, %259 : vector<16x1xf32>
    %261 = vector.broadcast %260 : vector<16x1xf32> to vector<16x64xf32>
    %262 = arith.subf %254, %261 : vector<16x64xf32>
    %263 = arith.mulf %262, %262 : vector<16x64xf32>
    %cst_100 = arith.constant dense<0.000000e+00> : vector<16xf32>
    %264 = vector.multi_reduction <add>, %263, %cst_100 [1] : vector<16x64xf32> to vector<16xf32>
    %265 = vector.shape_cast %264 : vector<16xf32> to vector<16x1xf32>
    %cst_101 = arith.constant 6.400000e+01 : f32
    %266 = vector.broadcast %cst_101 : f32 to vector<16x1xf32>
    %267 = arith.divf %265, %266 : vector<16x1xf32>
    %268 = vector.broadcast %260 : vector<16x1xf32> to vector<16x64xf32>
    %269 = arith.subf %254, %268 : vector<16x64xf32>
    %cst_102 = arith.constant 9.99999974E-6 : f32
    %270 = vector.broadcast %cst_102 : f32 to vector<16x1xf32>
    %271 = arith.addf %267, %270 : vector<16x1xf32>
    %272 = math.rsqrt %271 : vector<16x1xf32>
    %273 = vector.broadcast %272 : vector<16x1xf32> to vector<16x64xf32>
    %274 = arith.mulf %269, %273 : vector<16x64xf32>
    %275 = vector.broadcast %255 : vector<1x64xf32> to vector<16x64xf32>
    %276 = arith.mulf %274, %275 : vector<16x64xf32>
    %277 = vector.broadcast %256 : vector<1x64xf32> to vector<16x64xf32>
    %278 = arith.addf %276, %277 : vector<16x64xf32>
    %279 = arith.truncf %278 : vector<16x64xf32> to vector<16x64xbf16>
    %c0_103 = arith.constant 0 : index
    %c0_104 = arith.constant 0 : index
    %280 = vector.load %arg15[%c0_103, %c0_104] : memref<64x1024xbf16, #tpu.memory_space<vmem>>, vector<64x1024xbf16>
    %cst_105 = arith.constant dense<0.000000e+00> : vector<16x1024xf32>
    %281 = tpu.matmul %279, %280, %cst_105 {dimension_numbers = #tpu.dot_dimension_numbers<[1], [0], [0], [1], [0, 0, 1, 1], [], []>} : vector<16x64xbf16>, vector<64x1024xbf16>, vector<16x1024xf32> -> vector<16x1024xf32>
    %c0_106 = arith.constant 0 : index
    %c0_107 = arith.constant 0 : index
    %282 = vector.load %arg16[%c0_106, %c0_107] : memref<1x1024xf32, #tpu.memory_space<vmem>>, vector<1x1024xf32>
    %283 = vector.broadcast %282 : vector<1x1024xf32> to vector<16x1024xf32>
    %284 = arith.addf %281, %283 : vector<16x1024xf32>
    %285 = vector.shape_cast %284 : vector<16x1024xf32> to vector<2x8x1024xf32>
    %c0_108 = arith.constant 0 : index
    %c0_109 = arith.constant 0 : index
    %c0_110 = arith.constant 0 : index
    %286 = vector.load %arg17[%c0_108, %c0_109, %c0_110] : memref<2x8x1024xf32, #tpu.memory_space<vmem>>, vector<2x8x1024xf32>
    tpu.vector_store %arg17[%c0_108, %c0_109, %c0_110], %285 {strides = array<i32>} : memref<2x8x1024xf32, #tpu.memory_space<vmem>>, vector<2x8x1024xf32>,
    return
  }
  func.func @transform_0(%arg0: i32) -> (i32, i32, i32) {
    %c0_i32 = arith.constant 0 : i32
    %c0_i32_0 = arith.constant 0 : i32
    %c0_i32_1 = arith.constant 0 : i32
    return %arg0, %c0_i32, %c0_i32_0 : i32, i32, i32
  }
  func.func @transform_1(%arg0: i32) -> (i32, i32) {
    %c0_i32 = arith.constant 0 : i32
    %c0_i32_0 = arith.constant 0 : i32
    %c0_i32_1 = arith.constant 0 : i32
    return %c0_i32, %c0_i32_0 : i32, i32
  }
  func.func @transform_2(%arg0: i32) -> (i32, i32) {
    %c0_i32 = arith.constant 0 : i32
    %c0_i32_0 = arith.constant 0 : i32
    %c0_i32_1 = arith.constant 0 : i32
    return %c0_i32, %c0_i32_0 : i32, i32
  }
  func.func @transform_3(%arg0: i32) -> (i32, i32) {
    %c0_i32 = arith.constant 0 : i32
    %c0_i32_0 = arith.constant 0 : i32
    %c0_i32_1 = arith.constant 0 : i32
    return %c0_i32, %c0_i32_0 : i32, i32
  }
  func.func @transform_4(%arg0: i32) -> (i32, i32) {
    %c0_i32 = arith.constant 0 : i32
    %c0_i32_0 = arith.constant 0 : i32
    %c0_i32_1 = arith.constant 0 : i32
    return %c0_i32, %c0_i32_0 : i32, i32
  }
  func.func @transform_5(%arg0: i32) -> (i32, i32) {
    %c0_i32 = arith.constant 0 : i32
    %c0_i32_0 = arith.constant 0 : i32
    %c0_i32_1 = arith.constant 0 : i32
    return %c0_i32, %c0_i32_0 : i32, i32
  }
  func.func @transform_6(%arg0: i32) -> (i32, i32) {
    %c0_i32 = arith.constant 0 : i32
    %c0_i32_0 = arith.constant 0 : i32
    %c0_i32_1 = arith.constant 0 : i32
    return %c0_i32, %c0_i32_0 : i32, i32
  }
  func.func @transform_7(%arg0: i32) -> (i32, i32) {
    %c0_i32 = arith.constant 0 : i32
    %c0_i32_0 = arith.constant 0 : i32
    %c0_i32_1 = arith.constant 0 : i32
    return %c0_i32, %c0_i32_0 : i32, i32
  }
  func.func @transform_8(%arg0: i32) -> (i32, i32) {
    %c0_i32 = arith.constant 0 : i32
    %c0_i32_0 = arith.constant 0 : i32
    %c0_i32_1 = arith.constant 0 : i32
    return %c0_i32, %c0_i32_0 : i32, i32
  }
  func.func @transform_9(%arg0: i32) -> (i32, i32) {
    %c0_i32 = arith.constant 0 : i32
    %c0_i32_0 = arith.constant 0 : i32
    %c0_i32_1 = arith.constant 0 : i32
    return %c0_i32, %c0_i32_0 : i32, i32
  }
  func.func @transform_10(%arg0: i32) -> (i32, i32) {
    %c0_i32 = arith.constant 0 : i32
    %c0_i32_0 = arith.constant 0 : i32
    %c0_i32_1 = arith.constant 0 : i32
    return %c0_i32, %c0_i32_0 : i32, i32
  }
  func.func @transform_11(%arg0: i32) -> (i32, i32) {
    %c0_i32 = arith.constant 0 : i32
    %c0_i32_0 = arith.constant 0 : i32
    %c0_i32_1 = arith.constant 0 : i32
    return %c0_i32, %c0_i32_0 : i32, i32
  }
  func.func @transform_12(%arg0: i32) -> (i32, i32) {
    %c0_i32 = arith.constant 0 : i32
    %c0_i32_0 = arith.constant 0 : i32
    %c0_i32_1 = arith.constant 0 : i32
    return %c0_i32, %c0_i32_0 : i32, i32
  }
  func.func @transform_13(%arg0: i32) -> (i32, i32) {
    %c0_i32 = arith.constant 0 : i32
    %c0_i32_0 = arith.constant 0 : i32
    %c0_i32_1 = arith.constant 0 : i32
    return %c0_i32, %c0_i32_0 : i32, i32
  }
  func.func @transform_14(%arg0: i32) -> (i32, i32) {
    %c0_i32 = arith.constant 0 : i32
    %c0_i32_0 = arith.constant 0 : i32
    %c0_i32_1 = arith.constant 0 : i32
    return %c0_i32, %c0_i32_0 : i32, i32
  }
  func.func @transform_15(%arg0: i32) -> (i32, i32) {
    %c0_i32 = arith.constant 0 : i32
    %c0_i32_0 = arith.constant 0 : i32
    %c0_i32_1 = arith.constant 0 : i32
    return %c0_i32, %c0_i32_0 : i32, i32
  }
  func.func @transform_16(%arg0: i32) -> (i32, i32, i32) {
    %c0_i32 = arith.constant 0 : i32
    %c0_i32_0 = arith.constant 0 : i32
    %c0_i32_1 = arith.constant 0 : i32
    return %arg0, %c0_i32, %c0_i32_0 : i32, i32, i32
  }
}

</mosaic_0001>

<bundles_post_ra>
// kernel: tpu_custom_call.1
= control target key start
LH: loop header
LB: loop body
LE: loop exit
PB: predicated region body
PF: predicated region fallthrough
CT: control target
= control target key end

     0   :  { %s3614_s0 = inlined_call_operand.hbm [shape: f32[2,8,64], index: 0, kind: input, shape index: {}]   ;;  %s3615_s1 = inlined_call_operand.hbm [shape: f32[8,64], index: 1, kind: input, shape index: {}]   ;;  %s3616_s2 = inlined_call_operand.vmem [shape: bf16[64,192], index: 2, kind: input, shape index: {}]   ;;  %s3617_s3 = inlined_call_operand.hbm [shape: f32[1,192], index: 3, kind: input, shape index: {}]   ;;  %s3618_s4 = inlined_call_operand.vmem [shape: bf16[64,64], index: 4, kind: input, shape index: {}]   ;;  %s3619_s5 = inlined_call_operand.vmem [shape: f32[1,64], index: 5, kind: input, shape index: {}]   ;;  %s3620_s6 = inlined_call_operand.hbm [shape: f32[1,64], index: 6, kind: input, shape index: {}]   ;;  %s3621_s7 = inlined_call_operand.hbm [shape: f32[1,64], index: 7, kind: input, shape index: {}]   ;;  %s3622_s8 = inlined_call_operand.hbm [shape: bf16[64,128], index: 8, kind: input, shape index: {}]   ;;  %s3623_s9 = inlined_call_operand.hbm [shape: f32[1,128], index: 9, kind: input, shape index: {}]   ;;  %s3624_s10 = inlined_call_operand.vmem [shape: bf16[128,64], index: 10, kind: input, shape index: {}]   ;;  %s3625_s11 = inlined_call_operand.hbm [shape: f32[1,64], index: 11, kind: input, shape index: {}]   ;;  %s3626_s12 = inlined_call_operand.vmem [shape: f32[1,64], index: 12, kind: input, shape index: {}]   ;;  %s3627_s13 = inlined_call_operand.vmem [shape: f32[1,64], index: 13, kind: input, shape index: {}]   ;;  %s3628_s14 = inlined_call_operand.hbm [shape: bf16[64,1024], index: 14, kind: input, shape index: {}]   ;;  %s3629_s15 = inlined_call_operand.vmem [shape: f32[1,1024], index: 15, kind: input, shape index: {}]   ;;  %s3630_s16 = inlined_call_operand.hbm [shape: f32[2,8,1024], index: 16, kind: output, shape index: {}]  }
   0x1   :  { %3632 = sst [smem:[#allocation26_spill]] %s3614_s0 }
   0x2   :  { %21 = vsyncpa [#allocation5], 0 }
   0x3   :  { %22 = vsyncpa [#allocation8], 0 }
   0x4   :  { %23 = vsyncpa [#allocation11], 0 }
   0x5   :  { %24 = vsyncpa [#allocation14], 0 }
   0x6   :  { %25 = vsyncpa [#allocation17], 0 }
   0x7   :  { %26 = vsyncpa [#allocation6], 0  ;;  %s3037_s21 = smov [#allocation7]   ;;  %s3038_s23 = smov [#allocation10]  }
   0x8   :  { %s45_s22 = sshll.u32 %s3037_s21, 4  ;;  %s71_s24 = sshll.u32 %s3038_s23, 4  ;;  %s46_s22 = int_to_ptr.vmem [resolvable:$true] %s45_s22  ;;  %s72_s24 = int_to_ptr.vmem [resolvable:$true] %s71_s24 }
   0x9   :  { %s2805_s27 = scalar_lea.hbm %s3615_s1, 128 }
   0xa   :  { %p2806_p0 = scmp.ne.s32.totalorder %s3615_s1, %s2805_s27  ;;  %p2809_p1 = scmp.lt.u32.totalorder %s2805_s27, %s3615_s1 }
   0xc   :  { %p2811_p2 = pnand %p2809_p1, %p2806_p0 }
   0xe   :  { %2814 = shalt.err (!%p2811_p2)
}
   0xf   :  { %s2815_s17 = scalar_lea.vmem %s46_s22, 128  ;;  %p2820_p4 = scmp.lt.s32.totalorder %s46_s22, %s46_s22 }
  0x10   :  { %p2816_p3 = scmp.ne.s32.totalorder %s46_s22, %s2815_s17  ;;  %p2821_p5 = scmp.lt.s32.totalorder %s2815_s17, %s2815_s17 }
  0x12   :  { %p2822_p6 = por %p2821_p5, %p2820_p4 }
  0x14   :  { %p2823_p7 = pnand %p2822_p6, %p2816_p3 }
  0x16   :  { %2826 = shalt.err (!%p2823_p7)
}
  0x17   :  { %48 = dma.hbm_to_vmem [thread:$0]  %s3615_s1, 128, %s46_s22, [#allocation8]  }
  0x18   :  { %s2827_s23 = scalar_lea.hbm %s3620_s6, 16 }
  0x19   :  { %p2828_p8 = scmp.ne.s32.totalorder %s3620_s6, %s2827_s23  ;;  %p2831_p9 = scmp.lt.u32.totalorder %s2827_s23, %s3620_s6 }
  0x1b   :  { %p2833_p10 = pnand %p2831_p9, %p2828_p8 }
  0x1d   :  { %2836 = shalt.err (!%p2833_p10)
}
  0x1e   :  { %s2837_s29 = scalar_lea.vmem %s72_s24, 16  ;;  %s2841_s30 = scalar_lea.vmem %s72_s24, 32 }
  0x1f   :  { %p2838_p11 = scmp.ne.s32.totalorder %s72_s24, %s2837_s29  ;;  %p2842_p12 = scmp.lt.s32.totalorder %s72_s24, %s72_s24 }
  0x20   :  { %p2843_p13 = scmp.lt.s32.totalorder %s2841_s30, %s2837_s29 }
  0x22   :  { %p2844_p0 = por %p2843_p13, %p2842_p12 }
  0x24   :  { %p2845_p1 = pnand %p2844_p0, %p2838_p11 }
  0x26   :  { %2848 = shalt.err (!%p2845_p1)
}
  0x27   :  { %74 = dma.hbm_to_vmem [thread:$0]  %s3620_s6, 16, %s72_s24, [#allocation11]  }
  0x28   :  { %s3039_s0 = smov [#allocation13]   ;;  %s2849_s20 = scalar_lea.hbm %s3622_s8, 512 }
  0x29   :  { %s90_s17 = sshll.u32 %s3039_s0, 4  ;;  %p2850_p2 = scmp.ne.s32.totalorder %s3622_s8, %s2849_s20  ;;  %s91_s17 = int_to_ptr.vmem [resolvable:$true] %s90_s17 }
  0x2a   :  { %p2853_p3 = scmp.lt.u32.totalorder %s2849_s20, %s3622_s8 }
  0x2c   :  { %p2855_p4 = pnand %p2853_p3, %p2850_p2 }
  0x2e   :  { %2858 = shalt.err (!%p2855_p4)
}
  0x2f   :  { %s2859_s27 = scalar_lea.vmem %s91_s17, 512  ;;  %p2864_p6 = scmp.lt.s32.totalorder %s91_s17, %s91_s17 }
  0x30   :  { %p2860_p5 = scmp.ne.s32.totalorder %s91_s17, %s2859_s27  ;;  %p2865_p7 = scmp.lt.s32.totalorder %s2859_s27, %s2859_s27 }
  0x32   :  { %p2866_p8 = por %p2865_p7, %p2864_p6 }
  0x34   :  { %p2867_p9 = pnand %p2866_p8, %p2860_p5 }
  0x36   :  { %2870 = shalt.err (!%p2867_p9)
}
  0x37   :  { %s3040_s6 = smov 64   ;;  %s3041_s24 = smov 4  }
  0x38   :  { %96 = dma.hbm_to_vmem [thread:$0]  %s3622_s8, 512, %s91_s17, [#allocation14], %s3040_s6, %s3040_s6, %s3041_s24  }
  0x39   :  { %s3042_s30 = smov [#allocation16]   ;;  %s3043_s22 = smov [#allocation4]  }
  0x3a   :  { %s115_s1 = sshll.u32 %s3042_s30, 4  ;;  %s32_s0 = sshll.u32 %s3043_s22, 4  ;;  %s116_s1 = int_to_ptr.vmem [resolvable:$true] %s115_s1  ;;  %s33_s0 = int_to_ptr.vmem [resolvable:$true] %s32_s0 }
  0x3b   :  { %s2871_s20 = scalar_lea.hbm %s3625_s11, 16 }
  0x3c   :  { %p2872_p10 = scmp.ne.s32.totalorder %s3625_s11, %s2871_s20  ;;  %p2875_p11 = scmp.lt.u32.totalorder %s2871_s20, %s3625_s11 }
  0x3e   :  { %p2877_p12 = pnand %p2875_p11, %p2872_p10 }
  0x40   :  { %2880 = shalt.err (!%p2877_p12)
}
  0x41   :  { %s2881_s8 = scalar_lea.vmem %s116_s1, 16  ;;  %s2885_s17 = scalar_lea.vmem %s116_s1, 32 }
  0x42   :  { %p2882_p13 = scmp.ne.s32.totalorder %s116_s1, %s2881_s8  ;;  %p2886_p0 = scmp.lt.s32.totalorder %s116_s1, %s116_s1 }
  0x43   :  { %p2887_p1 = scmp.lt.s32.totalorder %s2885_s17, %s2881_s8 }
  0x45   :  { %p2888_p2 = por %p2887_p1, %p2886_p0 }
  0x47   :  { %p2889_p3 = pnand %p2888_p2, %p2882_p13 }
  0x49   :  { %2892 = shalt.err (!%p2889_p3)
}
  0x4a   :  { %118 = dma.hbm_to_vmem [thread:$0]  %s3625_s11, 16, %s116_s1, [#allocation17]  }
  0x4b   :  { %s3633_s30 = sld [smem:[#allocation26_spill]] }
  0x51   :  { %s2893_s22 = scalar_lea.hbm %s3633_s30, 256 }
  0x52   :  { %p2894_p4 = scmp.ne.s32.totalorder %s3633_s30, %s2893_s22  ;;  %p2897_p5 = scmp.lt.u32.totalorder %s2893_s22, %s3633_s30 }
  0x54   :  { %p2899_p6 = pnand %p2897_p5, %p2894_p4 }
  0x56   :  { %2902 = shalt.err (!%p2899_p6)
}
  0x57   :  { %s2903_s23 = scalar_lea.vmem %s33_s0, 256  ;;  %p2908_p8 = scmp.lt.s32.totalorder %s33_s0, %s33_s0 }
  0x58   :  { %p2904_p7 = scmp.ne.s32.totalorder %s33_s0, %s2903_s23  ;;  %p2909_p9 = scmp.lt.s32.totalorder %s2903_s23, %s2903_s23 }
  0x5a   :  { %p2910_p10 = por %p2909_p9, %p2908_p8 }
  0x5c   :  { %p2911_p11 = pnand %p2910_p10, %p2904_p7 }
  0x5e   :  { %2914 = shalt.err (!%p2911_p11)
}
  0x5f   :  { %s3044_s11 = smov 128   ;;  %s3045_s1 = smov 8  }
  0x60   :  { %38 = dma.hbm_to_vmem [thread:$0]  %s3633_s30, 256, %s33_s0, [#allocation5], %s3044_s11, %s3044_s11, %s3045_s1  }
  0x61   :  { %s3046_s8 = smov [#allocation9]   ;;  %s3047_s27 = smov [#allocation12]  }
  0x62   :  { %s57_s17 = sshll.u32 %s3046_s8, 4  ;;  %s81_s24 = sshll.u32 %s3047_s27, 4  ;;  %s58_s17 = int_to_ptr.vmem [resolvable:$true] %s57_s17  ;;  %s82_s24 = int_to_ptr.vmem [resolvable:$true] %s81_s24 }
  0x63   :  { %s2915_s22 = scalar_lea.hbm %s3617_s3, 32 }
  0x64   :  { %p2916_p12 = scmp.ne.s32.totalorder %s3617_s3, %s2915_s22  ;;  %p2919_p13 = scmp.lt.u32.totalorder %s2915_s22, %s3617_s3 }
  0x66   :  { %p2921_p0 = pnand %p2919_p13, %p2916_p12 }
  0x68   :  { %2924 = shalt.err (!%p2921_p0)
}
  0x69   :  { %s2925_s0 = scalar_lea.vmem %s58_s17, 32  ;;  %p2930_p2 = scmp.lt.s32.totalorder %s58_s17, %s58_s17 }
  0x6a   :  { %p2926_p1 = scmp.ne.s32.totalorder %s58_s17, %s2925_s0  ;;  %p2931_p3 = scmp.lt.s32.totalorder %s2925_s0, %s2925_s0 }
  0x6c   :  { %p2932_p4 = por %p2931_p3, %p2930_p2 }
  0x6e   :  { %p2933_p5 = pnand %p2932_p4, %p2926_p1 }
  0x70   :  { %2936 = shalt.err (!%p2933_p5)
}
  0x71   :  { %60 = dma.hbm_to_vmem [thread:$0]  %s3617_s3, 32, %s58_s17, [#allocation8]  }
  0x72   :  { %s2937_s25 = scalar_lea.hbm %s3621_s7, 16 }
  0x73   :  { %p2938_p6 = scmp.ne.s32.totalorder %s3621_s7, %s2937_s25  ;;  %p2941_p7 = scmp.lt.u32.totalorder %s2937_s25, %s3621_s7 }
  0x75   :  { %p2943_p8 = pnand %p2941_p7, %p2938_p6 }
  0x77   :  { %2946 = shalt.err (!%p2943_p8)
}
  0x78   :  { %s2947_s29 = scalar_lea.vmem %s82_s24, 16  ;;  %s2951_s22 = scalar_lea.vmem %s82_s24, 32 }
  0x79   :  { %p2948_p9 = scmp.ne.s32.totalorder %s82_s24, %s2947_s29  ;;  %p2952_p10 = scmp.lt.s32.totalorder %s82_s24, %s82_s24 }
  0x7a   :  { %p2953_p11 = scmp.lt.s32.totalorder %s2951_s22, %s2947_s29 }
  0x7c   :  { %p2954_p12 = por %p2953_p11, %p2952_p10 }
  0x7e   :  { %p2955_p13 = pnand %p2954_p12, %p2948_p9 }
  0x80   :  { %2958 = shalt.err (!%p2955_p13)
}
  0x81   :  { %84 = dma.hbm_to_vmem [thread:$0]  %s3621_s7, 16, %s82_s24, [#allocation11]  }
  0x82   :  { %s3048_s18 = smov [#allocation15]   ;;  %s3049_s20 = smov [#allocation18]  }
  0x83   :  { %s103_s19 = sshll.u32 %s3048_s18, 4  ;;  %s128_s21 = sshll.u32 %s3049_s20, 4  ;;  %s104_s19 = int_to_ptr.vmem [resolvable:$true] %s103_s19  ;;  %s129_s21 = int_to_ptr.vmem [resolvable:$true] %s128_s21 }
  0x84   :  { %s2959_s23 = scalar_lea.hbm %s3623_s9, 16 }
  0x85   :  { %p2960_p0 = scmp.ne.s32.totalorder %s3623_s9, %s2959_s23  ;;  %p2963_p1 = scmp.lt.u32.totalorder %s2959_s23, %s3623_s9 }
  0x87   :  { %p2965_p2 = pnand %p2963_p1, %p2960_p0 }
  0x89   :  { %2968 = shalt.err (!%p2965_p2)
}
  0x8a   :  { %s2969_s7 = scalar_lea.vmem %s104_s19, 16  ;;  %s2973_s24 = scalar_lea.vmem %s104_s19, 32 }
  0x8b   :  { %p2970_p3 = scmp.ne.s32.totalorder %s104_s19, %s2969_s7  ;;  %p2974_p4 = scmp.lt.s32.totalorder %s104_s19, %s104_s19 }
  0x8c   :  { %p2975_p5 = scmp.lt.s32.totalorder %s2973_s24, %s2969_s7 }
  0x8e   :  { %p2976_p6 = por %p2975_p5, %p2974_p4 }
  0x90   :  { %p2977_p7 = pnand %p2976_p6, %p2970_p3 }
  0x92   :  { %2980 = shalt.err (!%p2977_p7)
}
  0x93   :  { %106 = dma.hbm_to_vmem [thread:$0]  %s3623_s9, 16, %s104_s19, [#allocation14]  }
  0x94   :  { %s2981_s22 = scalar_lea.hbm %s3628_s14, 4096 }
  0x95   :  { %p2982_p8 = scmp.ne.s32.totalorder %s3628_s14, %s2981_s22  ;;  %p2985_p9 = scmp.lt.u32.totalorder %s2981_s22, %s3628_s14 }
  0x97   :  { %p2987_p10 = pnand %p2985_p9, %p2982_p8 }
  0x99   :  { %2990 = shalt.err (!%p2987_p10)
}
  0x9a   :  { %s2991_s0 = scalar_lea.vmem %s129_s21, 4096  ;;  %p2996_p12 = scmp.lt.s32.totalorder %s129_s21, %s129_s21 }
  0x9b   :  { %p2992_p11 = scmp.ne.s32.totalorder %s129_s21, %s2991_s0  ;;  %p2997_p13 = scmp.lt.s32.totalorder %s2991_s0, %s2991_s0 }
  0x9d   :  { %p2998_p0 = por %p2997_p13, %p2996_p12 }
  0x9f   :  { %p2999_p1 = pnand %p2998_p0, %p2992_p11 }
  0xa1   :  { %3002 = shalt.err (!%p2999_p1)
}
  0xa2   :  { %s3050_s9 = smov 512   ;;  %s3051_s19 = smov 32  }
  0xa3   :  { %134 = dma.hbm_to_vmem [thread:$0]  %s3628_s14, 4096, %s129_s21, [#allocation17], %s3050_s9, %s3050_s9, %s3051_s19  }
  0xa4   :  { %3025 = dma.done.wait [#allocation5], 256  }
  0xa5   :  { %3026 = vsyncadd [#allocation5], 4294967040 }
  0xa6   :  { %3027 = dma.done.wait [#allocation8], 160  }
  0xa7   :  { %3028 = vsyncadd [#allocation8], 4294967136 }
  0xa8   :  { %3029 = dma.done.wait [#allocation11], 32  }
  0xa9   :  { %3030 = vsyncadd [#allocation11], 4294967264 }
  0xaa   :  { %3031 = dma.done.wait [#allocation14], 528  }
  0xab   :  { %3032 = vsyncadd [#allocation14], 4294966768 }
  0xac   :  { %3033 = dma.done.wait [#allocation17], 4112  }
  0xad   :  { %3034 = vsyncadd [#allocation17], 4294963184  ;;  %v3052_v0 = vmov 0   ;;  %v2733_v1 = vld [vmem:[%s3616_s2 + $0x4] ss:$8 sps:$4 sm:$0xff]   ;;  %v165_v7 = vld [vmem:[#allocation4] sm:$0xff]  ;;  %v181_v15 = vlaneseq }
  0xae   :  { %267 = vmatprep.mubr.bf16.mxu0 %v3052_v0  ;;  %v2735_v2 = vld [vmem:[%s3616_s2] ss:$8 sps:$4 sm:$0xff]   ;;  %235 = vmatprep.subr.bf16.mxu0 %v2733_v1  ;;  %v2736_v3 = vld [vmem:[%s3616_s2 + $0x14] ss:$8 sps:$4 sm:$0xff]   ;;  %v2738_v4 = vld [vmem:[%s3616_s2 + $0x10] ss:$8 sps:$4 sm:$0xff]  }
  0xaf   :  { %236 = vmatpush1.bf16.msra.mxu0 %v2735_v2  ;;  %v2739_v5 = vld [vmem:[%s3616_s2 + $0x24] ss:$8 sps:$4 sm:$0xff]   ;;  %v2741_v6 = vld [vmem:[%s3616_s2 + $0x20] ss:$8 sps:$4 sm:$0xff]   ;;  %v2742_v8 = vld [vmem:[%s3616_s2 + $0x34] ss:$8 sps:$4 sm:$0xff]  }
  0xb0   :  { %237 = vmatprep.subr.bf16.mxu0 %v2736_v3  ;;  %v166_v9 = vld [vmem:[#allocation4 + $0x8] sm:$0xff]  ;;  %v167_v10 = vld [vmem:[#allocation7] sm:$0xff]  ;;  %vm231_vm0 = vcmask 523264   ;;  %v3290_v16 = vshrl.u32 %v181_v15, 7  ;;  %v3053_v17 = vmov 0.0   ;;  %vm3054_vm1 = vmmov 0  }
  0xb1   :  { %v2744_v11 = vld [vmem:[%s3616_s2 + $0x30] ss:$8 sps:$4 sm:$0xff]   ;;  %v3283_v12 = vadd.f32 %v167_v10, %v165_v7  ;;  %v3285_v13 = vadd.f32 %v167_v10, %v166_v9  ;;  %2508 = vmatprep.subr.bf16.mxu1 %v3053_v17  ;;  %v179_v19 = vld [vmem:[#allocation9] sm:$0x3]  ;;  %2510 = vmatprep.mubr.msk.bf16.mxu1 %vm3054_vm1, %v3053_v17  ;;  %s3055_s2 = smov 112   ;;  %s3056_s20 = smov 48  }
  0xb2   :  { %v183_v18 = vsub.s32 0, %v3290_v16  ;;  %v187_v20 = vsub.s32 1, %v3290_v16  ;;  %vm292_vm2 = vcmask 130048   ;;  %vm355_vm3 = vcmask 1043456   ;;  %s3057_s0 = smov 96   ;;  %v2745_v10 = vld [vmem:[%s3618_s4 + $0x8] sm:$0xff]  }
  0xb3   :  { %238 = vmatpush1.bf16.msra.mxu0 %v2738_v4  ;;  %v170_v14 = vpack.c.bf16 %v3285_v13, %v3283_v12  ;;  %vm339_vm4 = vcmask 64512   ;;  %s3058_s1 = smov 80   ;;  %s3059_s25 = smov 16  }
  0xb4   :  { %239 = vmatprep.subr.bf16.mxu0 %v2739_v5  ;;  %v184_v21 = vrot.slane %v179_v19, %v183_v18  ;;  %v188_v22 = vrot.slane %v179_v19, %v187_v20 }
  0xb7   :  { %240 = vmatpush1.bf16.msra.mxu0 %v2741_v6 }
  0xb8   :  { %241 = vmatprep.subr.bf16.mxu0 %v2742_v8 }
  0xbb   :  { %242 = vmatpush1.bf16.msra.mxu0 %v2744_v11 }
  0xbc   :  { %2520 = vmatprep.subr.bf16.mxu0 %v3053_v17 }
  0xbe   :  { %2357 = vmatmul.mubr.msk.bf16.vlgmr.msra.gmra.mrb[0].mxu0 %vm231_vm0, %v170_v14 }
  0xbf   :  { %2522 = vmatprep.mubr.msk.bf16.mxu0 %vm3054_vm1, %v3053_v17 }
 0x191   :  { %v269_v23 = vpop.f32.mrb[0].mxu0 }
 0x192   :  { %v270_v24 = vadd.f32 %v269_v23, %v184_v21  ;;  %v271_v25 = vpop.f32.mrb[1].mxu0 }
 0x193   :  { %v272_v26 = vadd.f32 %v271_v25, %v188_v22  ;;  %v273_v27 = vpop.f32.mrb[2].mxu0 }
 0x194   :  { %v3304_v28 = vadd.f32 %v273_v27, %v184_v21  ;;  %v275_v29 = vpop.f32.mrb[3].mxu0  ;;  %v3306_v30 = vpack.c.bf16 %v270_v24, %v270_v24 }
 0x195   :  { %279 = vst.msk [vmem:[#allocation2 + $0x8] sm:$0xff] %vm231_vm0, %v272_v26  ;;  %v276_v31 = vadd.f32 %v275_v29, %v188_v22  ;;  %v2746_v22 = vld [vmem:[%s3618_s4] sm:$0xff]  }
 0x196   :  { %402 = vrot.lane.b32.xlu1 %v3306_v30, %s3055_s2  ;;  %290 = vrot.lane.b32.xlu0 %v3306_v30, %s3040_s6 }
 0x197   :  { %281 = vst.msk [vmem:[#allocation2 + $0x18] sm:$0xff] %vm231_vm0, %v276_v31 }
 0x19a   :  { %404 = vrot.lane.b32.xlu0 %v3306_v30, %s3056_s20 }
 0x19c   :  { %v286_v34 = vld [vmem:[#allocation2 + $0x8] sm:$0xff] }
 0x19d   :  { %v3319_v37 = vpack.c.bf16 %v286_v34, %v286_v34 }
 0x19f   :  { %v357_v38 = vsel %vm355_vm3, %v3319_v37, 0 }
 0x208   :  { %v291_v32 = vpop.permute.xlu0 %290  ;;  %v403_v39 = vpop.permute.xlu1 %402 }
 0x209   :  { %v297_v33 = vsel %vm292_vm2, %v291_v32, 0 }
 0x20a   :  { %2509 = vmatpush3.bf16.xpose.msra.mxu1 %v297_v33 }
 0x20b   :  { %2514 = vmatprep.subr.bf16.mxu1 %v3053_v17 }
 0x20c   :  { %v405_v35 = vpop.permute.xlu0 %404 }
 0x20d   :  { %v410_v36 = vsel %vm292_vm2, %v405_v35, 0 }
 0x20e   :  { %2521 = vmatpush3.bf16.xpose.msra.mxu0 %v410_v36 }
 0x20f   :  { %2532 = vmatprep.subr.bf16.mxu0 %v3053_v17 }
 0x211   :  { %2511 = vmatmul.mubr.msk.bf16.vlgmr.msra.gmra.mrb[0].mxu1 %vm292_vm2, %v3306_v30 }
 0x212   :  { %2515 = vmatpush3.bf16.msra.mxu1 %v357_v38  ;;  %2516 = vmatprep.mubr.msk.bf16.mxu1 %vm3054_vm1, %v3053_v17 }
 0x213   :  { %2526 = vmatprep.subr.bf16.mxu1 %v3053_v17 }
 0x215   :  { %2523 = vmatmul.mubr.msk.bf16.vlgmr.msra.gmra.mrb[4].mxu0 %vm292_vm2, %v403_v39 }
 0x216   :  { %2534 = vmatprep.mubr.msk.bf16.mxu0 %vm3054_vm1, %v3053_v17  ;;  %2533 = vmatpush3.bf16.msra.mxu0 %v2745_v10 }
 0x217   :  { %2538 = vmatprep.subr.bf16.mxu0 %v3053_v17 }
 0x2e4   :  { %v333_v40 = vpop.f32.mrb[0].mxu1 }
 0x2e5   :  { %v2512_v41 = vpop.f32.mrb[1].mxu1  ;;  %v340_v42 = vsel %vm339_vm4, %v333_v40, -inf }
 0x2e6   :  { %341 = vmax.xlane.f32.xlu1 %v340_v42  ;;  %v336_v43 = vpop.f32.mrb[2].mxu1 }
 0x2e7   :  { %v2513_v44 = vpop.f32.mrb[3].mxu1 }
 0x2e8   :  { %v446_v45 = vpop.f32.mrb[4].mxu0 }
 0x2e9   :  { %v2524_v46 = vpop.f32.mrb[5].mxu0  ;;  %v452_v47 = vsel %vm339_vm4, %v446_v45, -inf }
 0x2ea   :  { %453 = vmax.xlane.f32.xlu0 %v452_v47  ;;  %v449_v48 = vpop.f32.mrb[6].mxu0 }
 0x2eb   :  { %v2525_v49 = vpop.f32.mrb[7].mxu0 }
 0x373   :  { %v342_v50 = vpop.xlane.xlu1 %341 }
 0x374   :  { %v343_v51 = vsub.f32 %v333_v40, %v342_v50 }
 0x376   :  { %v344_v52 = vmul.f32 1.442695, %v343_v51 }
 0x377   :  { %v454_v53 = vpop.xlane.xlu0 %453 }
 0x378   :  { %2765 = vpow2.f32 %v344_v52  ;;  %v455_v54 = vsub.f32 %v446_v45, %v454_v53 }
 0x37a   :  { %v456_v55 = vmul.f32 1.442695, %v455_v54 }
 0x37c   :  { %2767 = vpow2.f32 %v456_v55 }
 0x382   :  { %v2766_v56 = vpop.eup %2765 }
 0x383   :  { %v346_v57 = vsel %vm339_vm4, %v2766_v56, 0.0 }
 0x384   :  { %347 = vadd.xlane.f32.xlu0 %v346_v57 }
 0x386   :  { %v2768_v58 = vpop.eup %2767 }
 0x387   :  { %v458_v59 = vsel %vm339_vm4, %v2768_v58, 0.0 }
 0x388   :  { %459 = vadd.xlane.f32.xlu1 %v458_v59 }
 0x399   :  { %616 = vrot.lane.b32.xlu1 %v3306_v30, %s3051_s19 }
 0x39a   :  { %465 = vrot.lane.b32.xlu0 %v3319_v37, %s3055_s2 }
 0x39d   :  { %614 = vrot.lane.b32.xlu1 %v3306_v30, %s3057_s0 }
 0x411   :  { %v348_v60 = vpop.xlane.xlu0 %347 }
 0x412   :  { %2769 = vrcp.f32 %v348_v60  ;;  %v3397_v60 = vpack.c.bf16 %v3304_v28, %v3304_v28 }
 0x415   :  { %v460_v61 = vpop.xlane.xlu1 %459  ;;  %v466_v1 = vpop.permute.xlu0 %465 }
 0x416   :  { %2771 = vrcp.f32 %v460_v61  ;;  %v471_v4 = vsel %vm355_vm3, %v466_v1, 0 }
 0x419   :  { %v617_v6 = vpop.permute.xlu1 %616 }
 0x41a   :  { %v622_v8 = vsel %vm292_vm2, %v617_v6, 0 }
 0x41c   :  { %v2770_v62 = vpop.eup %2769 }
 0x41d   :  { %v350_v63 = vmul.f32 %v2770_v62, %v2766_v56  ;;  %v615_v9 = vpop.permute.xlu1 %614 }
 0x41f   :  { %v351_v2 = vpack.c.bf16 %v350_v63, %v350_v63 }
 0x420   :  { %v2772_v3 = vpop.eup %2771 }
 0x421   :  { %2517 = vmatmul.mubr.msk.bf16.vlgmr.msra.gmra.mrb[4].mxu1 %vm339_vm4, %v351_v2  ;;  %v462_v5 = vmul.f32 %v2772_v3, %v2768_v58  ;;  %v945_v3 = vld [vmem:[#allocation2 + $0x18] sm:$0xff] }
 0x422   :  { %2527 = vmatpush3.bf16.msra.mxu1 %v471_v4  ;;  %2528 = vmatprep.mubr.msk.bf16.mxu1 %vm3054_vm1, %v3053_v17  ;;  %v3405_v4 = vpack.c.bf16 %v945_v3, %v945_v3 }
 0x423   :  { %2544 = vmatprep.subr.bf16.mxu1 %v3053_v17  ;;  %v463_v7 = vpack.c.bf16 %v462_v5, %v462_v5 }
 0x424   :  { %v1013_v28 = vsel %vm355_vm3, %v3405_v4, 0 }
 0x429   :  { %2529 = vmatmul.mubr.msk.bf16.vlgmr.msra.gmra.mrb[8].mxu1 %vm339_vm4, %v463_v7 }
 0x42a   :  { %2546 = vmatprep.mubr.msk.bf16.mxu1 %vm3054_vm1, %v3053_v17 }
 0x42b   :  { %2545 = vmatpush3.bf16.xpose.msra.mxu1 %v622_v8 }
 0x42c   :  { %2550 = vmatprep.subr.bf16.mxu1 %v3053_v17 }
 0x432   :  { %2547 = vmatmul.mubr.msk.bf16.vlgmr.msra.gmra.mrb[12].mxu1 %vm292_vm2, %v615_v9 }
 0x433   :  { %2552 = vmatprep.mubr.msk.bf16.mxu1 %vm3054_vm1, %v3053_v17 }
 0x4f4   :  { %v393_v11 = vpop.f32.mrb[4].mxu1 }
 0x4f5   :  { %v2518_v14 = vpop.f32.mrb[5].mxu1  ;;  %v399_v34 = vpack.c.bf16 %v393_v11, %v393_v11 }
 0x4f6   :  { %v396_v15 = vpop.f32.mrb[6].mxu1 }
 0x4f7   :  { %v2519_v19 = vpop.f32.mrb[7].mxu1 }
 0x4fc   :  { %v507_v21 = vpop.f32.mrb[8].mxu1 }
 0x4fd   :  { %v513_v23 = vpack.c.bf16 %v507_v21, %v507_v21  ;;  %v2530_v24 = vpop.f32.mrb[9].mxu1 }
 0x4fe   :  { %v510_v25 = vpop.f32.mrb[10].mxu1 }
 0x4ff   :  { %v2531_v26 = vpop.f32.mrb[11].mxu1  ;;  %2535 = vmatmul.mubr.msk.bf16.vlgmr.msra.gmra.mrb[8].mxu0 %vm292_vm2, %v513_v23  ;;  %v2748_v23 = vld [vmem:[%s3618_s4 + $0x18] sm:$0xff]  }
 0x500   :  { %2539 = vmatpush3.bf16.msra.mxu0 %v2746_v22  ;;  %2540 = vmatprep.mubr.msk.bf16.mxu0 %vm3054_vm1, %v3053_v17 }
 0x501   :  { %2556 = vmatprep.subr.bf16.mxu0 %v3053_v17 }
 0x505   :  { %v658_v27 = vpop.f32.mrb[12].mxu1 }
 0x506   :  { %v2548_v29 = vpop.f32.mrb[13].mxu1  ;;  %v664_v31 = vsel %vm339_vm4, %v658_v27, -inf }
 0x507   :  { %665 = vmax.xlane.f32.xlu0 %v664_v31  ;;  %v661_v32 = vpop.f32.mrb[14].mxu1 }
 0x508   :  { %v2549_v33 = vpop.f32.mrb[15].mxu1 }
 0x50b   :  { %2541 = vmatmul.mubr.msk.bf16.vlgmr.msra.gmra.mrb[8].mxu0 %vm292_vm2, %v399_v34 }
 0x50c   :  { %2558 = vmatprep.mubr.msk.bf16.mxu0 %vm3054_vm1, %v3053_v17 }
 0x51d   :  { %676 = vrot.lane.b32.xlu0 %v3319_v37, %s3057_s0 }
 0x521   :  { %777 = vrot.lane.b32.xlu0 %v3306_v30, %s3058_s1 }
 0x594   :  { %v666_v35 = vpop.xlane.xlu0 %665 }
 0x595   :  { %v667_v36 = vsub.f32 %v658_v27, %v666_v35 }
 0x597   :  { %v668_v38 = vmul.f32 1.442695, %v667_v36 }
 0x598   :  { %v677_v39 = vpop.permute.xlu0 %676 }
 0x599   :  { %2773 = vpow2.f32 %v668_v38  ;;  %v682_v40 = vsel %vm355_vm3, %v677_v39, 0 }
 0x59a   :  { %2551 = vmatpush3.bf16.msra.mxu1 %v682_v40 }
 0x59b   :  { %2562 = vmatprep.subr.bf16.mxu1 %v3053_v17 }
 0x59c   :  { %v778_v49 = vpop.permute.xlu0 %777 }
 0x5a3   :  { %v2774_v41 = vpop.eup %2773 }
 0x5a4   :  { %v670_v42 = vsel %vm339_vm4, %v2774_v41, 0.0 }
 0x5a5   :  { %671 = vadd.xlane.f32.xlu1 %v670_v42 }
 0x5b6   :  { %779 = vrot.lane.b32.xlu1 %v3306_v30, %s3059_s25  ;;  %v2747_v30 = vld [vmem:[%s3618_s4 + $0x10] sm:$0xff]  }
 0x5b7   :  { %2557 = vmatpush3.bf16.msra.mxu0 %v2747_v30 }
 0x5b8   :  { %2568 = vmatprep.subr.bf16.mxu0 %v3053_v17 }
 0x632   :  { %v672_v43 = vpop.xlane.xlu1 %671 }
 0x633   :  { %2775 = vrcp.f32 %v672_v43 }
 0x636   :  { %v780_v46 = vpop.permute.xlu1 %779 }
 0x637   :  { %v785_v48 = vsel %vm292_vm2, %v780_v46, 0 }
 0x63d   :  { %v2776_v44 = vpop.eup %2775 }
 0x63e   :  { %v674_v45 = vmul.f32 %v2776_v44, %v2774_v41 }
 0x640   :  { %v675_v47 = vpack.c.bf16 %v674_v45, %v674_v45 }
 0x642   :  { %2553 = vmatmul.mubr.msk.bf16.vlgmr.msra.gmra.mrb[16].mxu1 %vm339_vm4, %v675_v47 }
 0x643   :  { %2563 = vmatpush3.bf16.xpose.msra.mxu1 %v785_v48  ;;  %2564 = vmatprep.mubr.msk.bf16.mxu1 %vm3054_vm1, %v3053_v17 }
 0x644   :  { %2580 = vmatprep.subr.bf16.mxu1 %v3053_v17 }
 0x64a   :  { %2565 = vmatmul.mubr.msk.bf16.vlgmr.msra.gmra.mrb[20].mxu1 %vm292_vm2, %v778_v49 }
 0x64b   :  { %2582 = vmatprep.mubr.msk.bf16.mxu1 %vm3054_vm1, %v3053_v17 }
 0x715   :  { %v718_v50 = vpop.f32.mrb[16].mxu1 }
 0x716   :  { %v724_v51 = vpack.c.bf16 %v718_v50, %v718_v50  ;;  %v2554_v52 = vpop.f32.mrb[17].mxu1 }
 0x717   :  { %v721_v53 = vpop.f32.mrb[18].mxu1 }
 0x718   :  { %v2555_v54 = vpop.f32.mrb[19].mxu1  ;;  %2559 = vmatmul.mubr.msk.bf16.vlgmr.msra.gmra.mrb[8].mxu0 %vm292_vm2, %v724_v51 }
 0x719   :  { %2570 = vmatprep.mubr.msk.bf16.mxu0 %vm3054_vm1, %v3053_v17 }
 0x71d   :  { %v821_v55 = vpop.f32.mrb[20].mxu1 }
 0x71e   :  { %v2566_v56 = vpop.f32.mrb[21].mxu1  ;;  %v827_v57 = vsel %vm339_vm4, %v821_v55, -inf }
 0x71f   :  { %828 = vmax.xlane.f32.xlu1 %v827_v57  ;;  %v824_v58 = vpop.f32.mrb[22].mxu1 }
 0x720   :  { %v2567_v59 = vpop.f32.mrb[23].mxu1 }
 0x730   :  { %949 = vrot.lane.b32.xlu1 %v3397_v60, %s3040_s6 }
 0x734   :  { %1060 = vrot.lane.b32.xlu1 %v3397_v60, %s3056_s20 }
 0x7ac   :  { %v829_v61 = vpop.xlane.xlu1 %828 }
 0x7ad   :  { %v830_v62 = vsub.f32 %v821_v55, %v829_v61 }
 0x7af   :  { %v831_v63 = vmul.f32 1.442695, %v830_v62 }
 0x7b0   :  { %v950_v1 = vpop.permute.xlu1 %949 }
 0x7b1   :  { %2777 = vpow2.f32 %v831_v63  ;;  %v955_v2 = vsel %vm292_vm2, %v950_v1, 0 }
 0x7b2   :  { %2581 = vmatpush3.bf16.xpose.msra.mxu1 %v955_v2 }
 0x7b3   :  { %2586 = vmatprep.subr.bf16.mxu1 %v3053_v17 }
 0x7b4   :  { %v1061_v24 = vpop.permute.xlu1 %1060 }
 0x7b5   :  { %v1066_v31 = vsel %vm292_vm2, %v1061_v24, 0 }
 0x7b9   :  { %2583 = vmatmul.mubr.msk.bf16.vlgmr.msra.gmra.mrb[24].mxu1 %vm292_vm2, %v3397_v60 }
 0x7ba   :  { %2587 = vmatpush3.bf16.msra.mxu1 %v1013_v28  ;;  %2588 = vmatprep.mubr.msk.bf16.mxu1 %vm3054_vm1, %v3053_v17 }
 0x7bb   :  { %v2778_v5 = vpop.eup %2777  ;;  %2598 = vmatprep.subr.bf16.mxu1 %v3053_v17 }
 0x7bc   :  { %v833_v6 = vsel %vm339_vm4, %v2778_v5, 0.0 }
 0x7bd   :  { %834 = vadd.xlane.f32.xlu0 %v833_v6 }
 0x7d3   :  { %839 = vrot.lane.b32.xlu0 %v3319_v37, %s3058_s1 }
 0x7d7   :  { %1058 = vrot.lane.b32.xlu0 %v3397_v60, %s3055_s2 }
 0x84a   :  { %v835_v7 = vpop.xlane.xlu0 %834 }
 0x84b   :  { %2779 = vrcp.f32 %v835_v7 }
 0x84e   :  { %v840_v8 = vpop.permute.xlu0 %839 }
 0x84f   :  { %v845_v9 = vsel %vm355_vm3, %v840_v8, 0  ;;  %v2749_v8 = vld [vmem:[%s3618_s4 + $0x8] sm:$0xff]  }
 0x850   :  { %2569 = vmatpush3.bf16.msra.mxu0 %v845_v9 }
 0x851   :  { %2574 = vmatprep.subr.bf16.mxu0 %v3053_v17 }
 0x852   :  { %v1059_v33 = vpop.permute.xlu0 %1058 }
 0x855   :  { %v2780_v10 = vpop.eup %2779 }
 0x856   :  { %v837_v11 = vmul.f32 %v2780_v10, %v2778_v5  ;;  %v2750_v10 = vld [vmem:[%s3618_s4] sm:$0xff]  }
 0x858   :  { %v838_v14 = vpack.c.bf16 %v837_v11, %v837_v11 }
 0x85a   :  { %2571 = vmatmul.mubr.msk.bf16.vlgmr.msra.gmra.mrb[12].mxu0 %vm339_vm4, %v838_v14 }
 0x85b   :  { %2576 = vmatprep.mubr.msk.bf16.mxu0 %vm3054_vm1, %v3053_v17  ;;  %2575 = vmatpush3.bf16.msra.mxu0 %v2748_v23 }
 0x85c   :  { %2592 = vmatprep.subr.bf16.mxu0 %v3053_v17 }
 0x88c   :  { %v991_v37 = vpop.f32.mrb[24].mxu1 }
 0x88d   :  { %v2584_v15 = vpop.f32.mrb[25].mxu1  ;;  %v997_v19 = vsel %vm339_vm4, %v991_v37, -inf }
 0x88e   :  { %998 = vmax.xlane.f32.xlu1 %v997_v19  ;;  %v994_v21 = vpop.f32.mrb[26].mxu1 }
 0x88f   :  { %v2585_v22 = vpop.f32.mrb[27].mxu1 }
 0x91b   :  { %v999_v34 = vpop.xlane.xlu1 %998 }
 0x91c   :  { %v1000_v35 = vsub.f32 %v991_v37, %v999_v34 }
 0x91e   :  { %v1001_v36 = vmul.f32 1.442695, %v1000_v35 }
 0x920   :  { %2781 = vpow2.f32 %v1001_v36 }
 0x92a   :  { %v2782_v45 = vpop.eup %2781 }
 0x92b   :  { %v1003_v48 = vsel %vm339_vm4, %v2782_v45, 0.0 }
 0x92d   :  { %v881_v25 = vpop.f32.mrb[12].mxu0 }
 0x92e   :  { %v887_v26 = vpack.c.bf16 %v881_v25, %v881_v25  ;;  %v2572_v27 = vpop.f32.mrb[13].mxu0 }
 0x92f   :  { %v884_v29 = vpop.f32.mrb[14].mxu0 }
 0x930   :  { %v2573_v32 = vpop.f32.mrb[15].mxu0  ;;  %2577 = vmatmul.mubr.msk.bf16.vlgmr.msra.gmra.mrb[8].mxu0 %vm292_vm2, %v887_v26 }
 0x931   :  { %2593 = vmatpush3.bf16.xpose.msra.mxu0 %v1066_v31  ;;  %2594 = vmatprep.mubr.msk.bf16.mxu0 %vm3054_vm1, %v3053_v17 }
 0x932   :  { %2604 = vmatprep.subr.bf16.mxu0 %v3053_v17 }
 0x938   :  { %2595 = vmatmul.mubr.msk.bf16.vlgmr.msra.gmra.mrb[16].mxu0 %vm292_vm2, %v1059_v33 }
 0x939   :  { %2606 = vmatprep.mubr.msk.bf16.mxu0 %vm3054_vm1, %v3053_v17  ;;  %2605 = vmatpush3.bf16.msra.mxu0 %v2749_v8 }
 0x93a   :  { %2610 = vmatprep.subr.bf16.mxu0 %v3053_v17 }
 0xa03   :  { %v933_v38 = vpop.f32.mrb[8].mxu0 }
 0xa04   :  { %940 = vst.msk [vmem:[#allocation3] sm:$0xff] %vm231_vm0, %v933_v38  ;;  %v2578_v39 = vpop.f32.mrb[9].mxu0 }
 0xa05   :  { %v936_v40 = vpop.f32.mrb[10].mxu0 }
 0xa06   :  { %v2579_v41 = vpop.f32.mrb[11].mxu0 }
 0xa0b   :  { %v1102_v42 = vpop.f32.mrb[16].mxu0 }
 0xa0c   :  { %v2596_v43 = vpop.f32.mrb[17].mxu0  ;;  %v1108_v44 = vsel %vm339_vm4, %v1102_v42, -inf }
 0xa0d   :  { %1109 = vmax.xlane.f32.xlu0 %v1108_v44  ;;  %v1105_v46 = vpop.f32.mrb[18].mxu0 }
 0xa0e   :  { %v2597_v47 = vpop.f32.mrb[19].mxu0 }
 0xa0f   :  { %v1598_v47 = vld [vmem:[#allocation3] sm:$0xff] }
 0xa11   :  { %1004 = vadd.xlane.f32.xlu0 %v1003_v48  ;;  %v2390_v48 = vld [vmem:[%s3619_s5] ss:$0 sm:$0xff] }
 0xa27   :  { %1121 = vrot.lane.b32.xlu0 %v3405_v4, %s3055_s2 }
 0xa9a   :  { %v1110_v49 = vpop.xlane.xlu0 %1109 }
 0xa9b   :  { %v1111_v30 = vsub.f32 %v1102_v42, %v1110_v49 }
 0xa9d   :  { %v1112_v50 = vmul.f32 1.442695, %v1111_v30  ;;  %v1607_v30 = vadd.f32 %v2390_v48, %v1598_v47 }
 0xa9e   :  { %v1005_v51 = vpop.xlane.xlu0 %1004 }
 0xa9f   :  { %2783 = vpow2.f32 %v1112_v50 }
 0xaa0   :  { %2785 = vrcp.f32 %v1005_v51 }
 0xaa2   :  { %v1122_v56 = vpop.permute.xlu0 %1121 }
 0xaa3   :  { %v1127_v58 = vsel %vm355_vm3, %v1122_v56, 0 }
 0xaa9   :  { %v2784_v52 = vpop.eup %2783 }
 0xaaa   :  { %v2786_v53 = vpop.eup %2785  ;;  %v1114_v54 = vsel %vm339_vm4, %v2784_v52, 0.0 }
 0xaab   :  { %v1007_v55 = vmul.f32 %v2786_v53, %v2782_v45  ;;  %1115 = vadd.xlane.f32.xlu1 %v1114_v54  ;;  %v1609_v53 = vadd.f32 %v1607_v30, %v3283_v12 }
 0xaad   :  { %v1008_v57 = vpack.c.bf16 %v1007_v55, %v1007_v55  ;;  %v1613_v56 = vsel %vm231_vm0, %v1609_v53, 0.0 }
 0xaaf   :  { %2589 = vmatmul.mubr.msk.bf16.vlgmr.msra.gmra.mrb[28].mxu1 %vm339_vm4, %v1008_v57 }
 0xab0   :  { %2599 = vmatpush3.bf16.msra.mxu1 %v1127_v58  ;;  %2600 = vmatprep.mubr.msk.bf16.mxu1 %vm3054_vm1, %v3053_v17 }
 0xab1   :  { %2616 = vmatprep.subr.bf16.mxu1 %v3053_v17 }
 0xabc   :  { %1272 = vrot.lane.b32.xlu1 %v3397_v60, %s3051_s19 }
 0xac0   :  { %1270 = vrot.lane.b32.xlu1 %v3397_v60, %s3057_s0 }
 0xb38   :  { %v1116_v59 = vpop.xlane.xlu1 %1115 }
 0xb39   :  { %2787 = vrcp.f32 %v1116_v59 }
 0xb3c   :  { %v1273_v63 = vpop.permute.xlu1 %1272 }
 0xb3d   :  { %v1278_v2 = vsel %vm292_vm2, %v1273_v63, 0 }
 0xb40   :  { %v1271_v3 = vpop.permute.xlu1 %1270 }
 0xb43   :  { %v2788_v61 = vpop.eup %2787 }
 0xb44   :  { %v1118_v62 = vmul.f32 %v2788_v61, %v2784_v52 }
 0xb46   :  { %v1119_v1 = vpack.c.bf16 %v1118_v62, %v1118_v62 }
 0xb48   :  { %2601 = vmatmul.mubr.msk.bf16.vlgmr.msra.gmra.mrb[32].mxu1 %vm339_vm4, %v1119_v1 }
 0xb49   :  { %2617 = vmatpush3.bf16.xpose.msra.mxu1 %v1278_v2  ;;  %2618 = vmatprep.mubr.msk.bf16.mxu1 %vm3054_vm1, %v3053_v17 }
 0xb4a   :  { %2622 = vmatprep.subr.bf16.mxu1 %v3053_v17 }
 0xb50   :  { %2619 = vmatmul.mubr.msk.bf16.vlgmr.msra.gmra.mrb[36].mxu1 %vm292_vm2, %v1271_v3 }
 0xb51   :  { %2624 = vmatprep.mubr.msk.bf16.mxu1 %vm3054_vm1, %v3053_v17 }
 0xb82   :  { %v1049_v28 = vpop.f32.mrb[28].mxu1 }
 0xb83   :  { %v2590_v5 = vpop.f32.mrb[29].mxu1  ;;  %v1055_v25 = vpack.c.bf16 %v1049_v28, %v1049_v28  ;;  %v2752_v28 = vld [vmem:[%s3618_s4 + $0x18] sm:$0xff]  }
 0xb84   :  { %v1052_v6 = vpop.f32.mrb[30].mxu1 }
 0xb85   :  { %v2591_v7 = vpop.f32.mrb[31].mxu1 }
 0xc1b   :  { %v1163_v9 = vpop.f32.mrb[32].mxu1 }
 0xc1c   :  { %v1169_v11 = vpack.c.bf16 %v1163_v9, %v1163_v9  ;;  %v2602_v14 = vpop.f32.mrb[33].mxu1 }
 0xc1d   :  { %v1166_v37 = vpop.f32.mrb[34].mxu1 }
 0xc1e   :  { %v2603_v15 = vpop.f32.mrb[35].mxu1  ;;  %2607 = vmatmul.mubr.msk.bf16.vlgmr.msra.gmra.mrb[20].mxu0 %vm292_vm2, %v1169_v11 }
 0xc1f   :  { %2611 = vmatpush3.bf16.msra.mxu0 %v2750_v10  ;;  %2612 = vmatprep.mubr.msk.bf16.mxu0 %vm3054_vm1, %v3053_v17 }
 0xc20   :  { %2628 = vmatprep.subr.bf16.mxu0 %v3053_v17 }
 0xc23   :  { %v1314_v19 = vpop.f32.mrb[36].mxu1 }
 0xc24   :  { %v2620_v21 = vpop.f32.mrb[37].mxu1  ;;  %v1320_v22 = vsel %vm339_vm4, %v1314_v19, -inf }
 0xc25   :  { %1321 = vmax.xlane.f32.xlu0 %v1320_v22  ;;  %v1317_v23 = vpop.f32.mrb[38].mxu1 }
 0xc26   :  { %v2621_v24 = vpop.f32.mrb[39].mxu1 }
 0xc2a   :  { %2613 = vmatmul.mubr.msk.bf16.vlgmr.msra.gmra.mrb[20].mxu0 %vm292_vm2, %v1055_v25 }
 0xc2b   :  { %2630 = vmatprep.mubr.msk.bf16.mxu0 %vm3054_vm1, %v3053_v17 }
 0xc3b   :  { %1332 = vrot.lane.b32.xlu0 %v3405_v4, %s3057_s0 }
 0xc3f   :  { %1433 = vrot.lane.b32.xlu0 %v3397_v60, %s3058_s1 }
 0xcb2   :  { %v1322_v26 = vpop.xlane.xlu0 %1321 }
 0xcb3   :  { %v1323_v27 = vsub.f32 %v1314_v19, %v1322_v26 }
 0xcb5   :  { %v1324_v29 = vmul.f32 1.442695, %v1323_v27 }
 0xcb6   :  { %v1333_v31 = vpop.permute.xlu0 %1332 }
 0xcb7   :  { %2789 = vpow2.f32 %v1324_v29  ;;  %v1338_v32 = vsel %vm355_vm3, %v1333_v31, 0 }
 0xcb8   :  { %2623 = vmatpush3.bf16.msra.mxu1 %v1338_v32 }
 0xcb9   :  { %2634 = vmatprep.subr.bf16.mxu1 %v3053_v17 }
 0xcba   :  { %v1434_v42 = vpop.permute.xlu0 %1433 }
 0xcc1   :  { %v2790_v33 = vpop.eup %2789 }
 0xcc2   :  { %v1326_v34 = vsel %vm339_vm4, %v2790_v33, 0.0 }
 0xcc3   :  { %1327 = vadd.xlane.f32.xlu1 %v1326_v34 }
 0xcd4   :  { %1435 = vrot.lane.b32.xlu1 %v3397_v60, %s3059_s25  ;;  %v2751_v60 = vld [vmem:[%s3618_s4 + $0x10] sm:$0xff]  }
 0xcd5   :  { %2629 = vmatpush3.bf16.msra.mxu0 %v2751_v60  ;;  %v2761_v60 = vld [vmem:[%s3624_s10 + $0x20] sm:$0xff]  }
 0xcd6   :  { %2640 = vmatprep.subr.bf16.mxu0 %v3053_v17 }
 0xd50   :  { %v1328_v35 = vpop.xlane.xlu1 %1327 }
 0xd51   :  { %2791 = vrcp.f32 %v1328_v35  ;;  %v2753_v35 = vld [vmem:[#allocation13] sm:$0xff]  }
 0xd54   :  { %v1436_v39 = vpop.permute.xlu1 %1435 }
 0xd55   :  { %v1441_v41 = vsel %vm292_vm2, %v1436_v39, 0  ;;  %v2757_v39 = vld [vmem:[%s3624_s10] sm:$0xff]  }
 0xd5b   :  { %v2792_v36 = vpop.eup %2791 }
 0xd5c   :  { %v1330_v38 = vmul.f32 %v2792_v36, %v2790_v33  ;;  %v2754_v36 = vld [vmem:[#allocation13 + $0x8] sm:$0xff]  }
 0xd5e   :  { %v1331_v40 = vpack.c.bf16 %v1330_v38, %v1330_v38  ;;  %v2756_v38 = vld [vmem:[#allocation13 + $0x18] sm:$0xff]  }
 0xd60   :  { %2625 = vmatmul.mubr.msk.bf16.vlgmr.msra.gmra.mrb[40].mxu1 %vm339_vm4, %v1331_v40  ;;  %v2758_v40 = vld [vmem:[%s3624_s10 + $0x8] sm:$0xff]  }
 0xd61   :  { %2635 = vmatpush3.bf16.xpose.msra.mxu1 %v1441_v41  ;;  %2636 = vmatprep.mubr.msk.bf16.mxu1 %vm3054_vm1, %v3053_v17  ;;  %v2759_v41 = vld [vmem:[%s3624_s10 + $0x10] sm:$0xff]  }
 0xd62   :  { %2652 = vmatprep.subr.bf16.mxu1 %v3053_v17 }
 0xd68   :  { %2637 = vmatmul.mubr.msk.bf16.vlgmr.msra.gmra.mrb[44].mxu1 %vm292_vm2, %v1434_v42  ;;  %v2760_v42 = vld [vmem:[%s3624_s10 + $0x18] sm:$0xff]  }
 0xd69   :  { %2660 = vmatprep.mubr.msk.bf16.mxu1 %vm3054_vm1, %v3053_v17  ;;  %2653 = vmatpush3.bf16.msra.mxu1 %v2753_v35  ;;  %v1902_v35 = vld [vmem:[#allocation18] sm:$0xff] }
 0xd6a   :  { %2654 = vmatprep.subr.bf16.mxu1 %v3053_v17 }
 0xd6d   :  { %2655 = vmatpush3.bf16.msra.mxu1 %v2754_v36  ;;  %v1906_v36 = vld [vmem:[#allocation18 + $0x20] sm:$0xff] }
 0xd6e   :  { %2656 = vmatprep.subr.bf16.mxu1 %v3053_v17 }
 0xe33   :  { %v1374_v43 = vpop.f32.mrb[40].mxu1 }
 0xe34   :  { %v1380_v44 = vpack.c.bf16 %v1374_v43, %v1374_v43  ;;  %v2626_v45 = vpop.f32.mrb[41].mxu1  ;;  %v2762_v43 = vld [vmem:[%s3624_s10 + $0x28] sm:$0xff]  }
 0xe35   :  { %v1377_v46 = vpop.f32.mrb[42].mxu1 }
 0xe36   :  { %v2627_v49 = vpop.f32.mrb[43].mxu1  ;;  %2631 = vmatmul.mubr.msk.bf16.vlgmr.msra.gmra.mrb[20].mxu0 %vm292_vm2, %v1380_v44 }
 0xe37   :  { %2642 = vmatprep.mubr.msk.bf16.mxu0 %vm3054_vm1, %v3053_v17 }
 0xe3b   :  { %v1477_v50 = vpop.f32.mrb[44].mxu1 }
 0xe3c   :  { %v2638_v51 = vpop.f32.mrb[45].mxu1  ;;  %v1483_v52 = vsel %vm339_vm4, %v1477_v50, -inf }
 0xe3d   :  { %1484 = vmax.xlane.f32.xlu1 %v1483_v52  ;;  %v1480_v54 = vpop.f32.mrb[46].mxu1  ;;  %v2391_v51 = vld [vmem:[#allocation10] ss:$0 sm:$0xff] }
 0xe3e   :  { %v2639_v55 = vpop.f32.mrb[47].mxu1 }
 0xe3f   :  { %v2392_v55 = vld [vmem:[#allocation12] ss:$0 sm:$0xff] }
 0xe41   :  { %1614 = vadd.xlane.f32.xlu1 %v1613_v56 }
 0xeca   :  { %v1485_v57 = vpop.xlane.xlu1 %1484 }
 0xecb   :  { %v1486_v58 = vsub.f32 %v1477_v50, %v1485_v57 }
 0xecd   :  { %v1487_v59 = vmul.f32 1.442695, %v1486_v58 }
 0xece   :  { %v1615_v14 = vpop.xlane.xlu1 %1614 }
 0xecf   :  { %2793 = vpow2.f32 %v1487_v59  ;;  %v1620_v19 = vmul.f32 0.015625, %v1615_v14 }
 0xed1   :  { %v1622_v22 = vsub.f32 %v1609_v53, %v1620_v19 }
 0xed3   :  { %v1624_v26 = vmul.f32 %v1622_v22, %v1622_v22 }
 0xed5   :  { %v1626_v27 = vsel %vm231_vm0, %v1624_v26, 0.0 }
 0xed9   :  { %v2794_v61 = vpop.eup %2793 }
 0xeda   :  { %v1489_v62 = vsel %vm339_vm4, %v2794_v61, 0.0 }
 0xedb   :  { %1490 = vadd.xlane.f32.xlu0 %v1489_v62  ;;  %v2764_v62 = vld [vmem:[%s3624_s10 + $0x38] sm:$0xff]  }
 0xef1   :  { %1495 = vrot.lane.b32.xlu0 %v3405_v4, %s3058_s1 }
 0xf68   :  { %v1491_v63 = vpop.xlane.xlu0 %1490 }
 0xf69   :  { %2795 = vrcp.f32 %v1491_v63  ;;  %v2393_v63 = vld [vmem:[#allocation15] ss:$0 sm:$0xff] }
 0xf6c   :  { %v1496_v12 = vpop.permute.xlu0 %1495 }
 0xf6d   :  { %v1501_v1 = vsel %vm355_vm3, %v1496_v12, 0 }
 0xf6e   :  { %2641 = vmatpush3.bf16.msra.mxu0 %v1501_v1 }
 0xf6f   :  { %2646 = vmatprep.subr.bf16.mxu0 %v3053_v17 }
 0xf73   :  { %v2796_v2 = vpop.eup %2795 }
 0xf74   :  { %v1493_v3 = vmul.f32 %v2796_v2, %v2794_v61  ;;  %v2763_v61 = vld [vmem:[%s3624_s10 + $0x30] sm:$0xff]  }
 0xf76   :  { %v1494_v5 = vpack.c.bf16 %v1493_v3, %v1493_v3 }
 0xf78   :  { %2643 = vmatmul.mubr.msk.bf16.vlgmr.msra.gmra.mrb[24].mxu0 %vm339_vm4, %v1494_v5 }
 0xf79   :  { %2647 = vmatpush3.bf16.msra.mxu0 %v2752_v28  ;;  %2648 = vmatprep.mubr.msk.bf16.mxu0 %vm3054_vm1, %v3053_v17 }
 0xf7a   :  { %2664 = vmatprep.subr.bf16.mxu0 %v3053_v17 }
0x104b   :  { %v1537_v4 = vpop.f32.mrb[24].mxu0 }
0x104c   :  { %v1543_v6 = vpack.c.bf16 %v1537_v4, %v1537_v4  ;;  %v2644_v7 = vpop.f32.mrb[25].mxu0 }
0x104d   :  { %v1540_v8 = vpop.f32.mrb[26].mxu0 }
0x104e   :  { %v2645_v9 = vpop.f32.mrb[27].mxu0  ;;  %2649 = vmatmul.mubr.msk.bf16.vlgmr.msra.gmra.mrb[20].mxu0 %vm292_vm2, %v1543_v6  ;;  %v2399_v8 = vld [vmem:[#allocation16] ss:$0 sm:$0xff] }
0x104f   :  { %2680 = vmatprep.mubr.msk.bf16.mxu0 %vm3054_vm1, %v3053_v17  ;;  %2665 = vmatpush3.bf16.msra.mxu0 %v2757_v39  ;;  %v1908_v39 = vld [vmem:[#allocation18 + $0x30] sm:$0xff] }
0x1050   :  { %2666 = vmatprep.subr.bf16.mxu0 %v3053_v17 }
0x1053   :  { %2667 = vmatpush3.bf16.msra.mxu0 %v2758_v40  ;;  %v2410_v40 = vcombine.low %v1902_v35, %v1906_v36 }
0x1054   :  { %2668 = vmatprep.subr.bf16.mxu0 %v3053_v17 }
0x1057   :  { %2669 = vmatpush3.bf16.msra.mxu0 %v2759_v41 }
0x1058   :  { %2670 = vmatprep.subr.bf16.mxu0 %v3053_v17 }
0x105b   :  { %2671 = vmatpush3.bf16.msra.mxu0 %v2760_v42 }
0x105c   :  { %2672 = vmatprep.subr.bf16.mxu0 %v3053_v17 }
0x105f   :  { %2673 = vmatpush3.bf16.msra.mxu0 %v2761_v60  ;;  %v1910_v60 = vld [vmem:[#allocation18 + $0x40] sm:$0xff] }
0x1060   :  { %2674 = vmatprep.subr.bf16.mxu0 %v3053_v17 }
0x1063   :  { %2675 = vmatpush3.bf16.msra.mxu0 %v2762_v43  ;;  %v1914_v43 = vld [vmem:[#allocation18 + $0x60] sm:$0xff] }
0x1064   :  { %2676 = vmatprep.subr.bf16.mxu0 %v3053_v17 }
0x1067   :  { %2677 = vmatpush3.bf16.msra.mxu0 %v2763_v61 }
0x1068   :  { %2678 = vmatprep.subr.bf16.mxu0 %v3053_v17 }
0x106b   :  { %2679 = vmatpush3.bf16.msra.mxu0 %v2764_v62 }
0x1121   :  { %v1589_v10 = vpop.f32.mrb[20].mxu0 }
0x1122   :  { %1597 = vst.msk [vmem:[#allocation3 + $0x8] sm:$0xff] %vm231_vm0, %v1589_v10  ;;  %v2650_v11 = vpop.f32.mrb[21].mxu0 }
0x1123   :  { %v1592_v37 = vpop.f32.mrb[22].mxu0 }
0x1124   :  { %v2651_v15 = vpop.f32.mrb[23].mxu0 }
0x1129   :  { %v1599_v21 = vld [vmem:[#allocation3 + $0x8] sm:$0xff] }
0x112a   :  { %v1608_v23 = vadd.f32 %v2390_v48, %v1599_v21 }
0x112c   :  { %v1610_v24 = vadd.f32 %v1608_v23, %v3285_v13  ;;  %v2755_v13 = vld [vmem:[#allocation13 + $0x10] sm:$0xff]  }
0x112d   :  { %2657 = vmatpush3.bf16.msra.mxu1 %v2755_v13  ;;  %v2411_v13 = vcombine.high %v1902_v35, %v1906_v36  ;;  %v1927_v35 = vld [vmem:[#allocation18 + $0xc8] sm:$0xff] }
0x112e   :  { %v1616_v25 = vsel %vm231_vm0, %v1610_v24, 0.0  ;;  %2658 = vmatprep.subr.bf16.mxu1 %v3053_v17  ;;  %v1931_v36 = vld [vmem:[#allocation18 + $0xe8] sm:$0xff] }
0x112f   :  { %1617 = vadd.xlane.f32.xlu1 %v1616_v25 }
0x1131   :  { %2659 = vmatpush3.bf16.msra.mxu1 %v2756_v38  ;;  %v1904_v38 = vld [vmem:[#allocation18 + $0x10] sm:$0xff] }
0x1132   :  { %v2415_v41 = vcombine.high %v1904_v38, %v1908_v39  ;;  %2139 = vmatprep.subr.bf16.mxu1 %v2411_v13  ;;  %v2414_v42 = vcombine.low %v1904_v38, %v1908_v39  ;;  %v2437_v38 = vcombine.high %v1927_v35, %v1931_v36  ;;  %v1905_v39 = vld [vmem:[#allocation18 + $0x18] sm:$0xff] }
0x1133   :  { %1627 = vadd.xlane.f32.xlu1 %v1626_v27 }
0x1134   :  { %2225 = vmatprep.subr.bf16.mxu0 %v2415_v41  ;;  %v2436_v41 = vcombine.low %v1927_v35, %v1931_v36 }
0x11bc   :  { %v1618_v29 = vpop.xlane.xlu1 %1617 }
0x11bd   :  { %v1621_v31 = vmul.f32 0.015625, %v1618_v29 }
0x11bf   :  { %v1623_v32 = vsub.f32 %v1610_v24, %v1621_v31 }
0x11c0   :  { %v1628_v44 = vpop.xlane.xlu1 %1627 }
0x11c1   :  { %v1625_v33 = vmul.f32 %v1623_v32, %v1623_v32  ;;  %v1632_v45 = vmul.f32 0.015625, %v1628_v44  ;;  %v2419_v44 = vcombine.high %v1910_v60, %v1914_v43 }
0x11c3   :  { %v1629_v34 = vsel %vm231_vm0, %v1625_v33, 0.0  ;;  %v1634_v46 = vadd.f32 1e-05, %v1632_v45  ;;  %v1912_v45 = vld [vmem:[#allocation18 + $0x50] sm:$0xff] }
0x11c4   :  { %1630 = vadd.xlane.f32.xlu1 %v1629_v34 }
0x11c5   :  { %2797 = vrsqrt.f32 %v1634_v46  ;;  %v1916_v46 = vld [vmem:[#allocation18 + $0x70] sm:$0xff] }
0x11cf   :  { %v2798_v30 = vpop.eup %2797 }
0x11d0   :  { %v1638_v50 = vmul.f32 %v2798_v30, %v1622_v22  ;;  %v1918_v30 = vld [vmem:[#allocation18 + $0x80] sm:$0xff] }
0x11d2   :  { %v1646_v53 = vmul.f32 %v2391_v51, %v1638_v50  ;;  %v1922_v50 = vld [vmem:[#allocation18 + $0xa0] sm:$0xff] }
0x11d4   :  { %v1654_v57 = vadd.f32 %v2392_v55, %v1646_v53  ;;  %v1924_v53 = vld [vmem:[#allocation18 + $0xb0] sm:$0xff] }
0x1251   :  { %v1631_v47 = vpop.xlane.xlu1 %1630 }
0x1252   :  { %v1633_v48 = vmul.f32 0.015625, %v1631_v47  ;;  %v2418_v47 = vcombine.low %v1910_v60, %v1914_v43  ;;  %v1913_v60 = vld [vmem:[#allocation18 + $0x58] sm:$0xff] }
0x1253   :  { %v1917_v43 = vld [vmem:[#allocation18 + $0x78] sm:$0xff] }
0x1254   :  { %v1635_v49 = vadd.f32 1e-05, %v1633_v48  ;;  %v2423_v48 = vcombine.high %v1912_v45, %v1916_v46 }
0x1256   :  { %2799 = vrsqrt.f32 %v1635_v49  ;;  %v2422_v49 = vcombine.low %v1912_v45, %v1916_v46  ;;  %v2425_v45 = vcombine.high %v1913_v60, %v1917_v43  ;;  %v1921_v46 = vld [vmem:[#allocation18 + $0x98] sm:$0xff] }
0x1260   :  { %v2800_v52 = vpop.eup %2799 }
0x1261   :  { %v1639_v54 = vmul.f32 %v2800_v52, %v1623_v32  ;;  %v1920_v52 = vld [vmem:[#allocation18 + $0x90] sm:$0xff] }
0x1263   :  { %v1647_v56 = vmul.f32 %v2391_v51, %v1639_v54  ;;  %v2427_v51 = vcombine.high %v1918_v30, %v1922_v50  ;;  %v2426_v54 = vcombine.low %v1918_v30, %v1922_v50  ;;  %v1929_v30 = vld [vmem:[#allocation18 + $0xd8] sm:$0xff] }
0x1264   :  { %v1933_v50 = vld [vmem:[#allocation18 + $0xf8] sm:$0xff] }
0x1265   :  { %v1655_v58 = vadd.f32 %v2392_v55, %v1647_v56  ;;  %v2431_v55 = vcombine.high %v1920_v52, %v1924_v53  ;;  %v2430_v56 = vcombine.low %v1920_v52, %v1924_v53  ;;  %v2441_v52 = vcombine.high %v1929_v30, %v1933_v50 }
0x1266   :  { %v2440_v53 = vcombine.low %v1929_v30, %v1933_v50 }
0x1267   :  { %v1656_v59 = vpack.c.bf16 %v1655_v58, %v1654_v57 }
0x1269   :  { %2661 = vmatmul.mubr.msk.bf16.vlgmr.msra.gmra.mrb[48].mxu1 %vm231_vm0, %v1656_v59  ;;  %v1928_v59 = vld [vmem:[#allocation18 + $0xd0] sm:$0xff] }
0x126a   :  { %2171 = vmatprep.mubr.bf16.mxu1 %v3052_v0  ;;  %2140 = vmatpush1.bf16.msra.mxu1 %v2410_v40  ;;  %v1909_v40 = vld [vmem:[#allocation18 + $0x38] sm:$0xff] }
0x126b   :  { %2141 = vmatprep.subr.bf16.mxu1 %v2419_v44  ;;  %v2416_v44 = vcombine.low %v1905_v39, %v1909_v40 }
0x126e   :  { %2142 = vmatpush1.bf16.msra.mxu1 %v2418_v47  ;;  %v1925_v47 = vld [vmem:[#allocation18 + $0xb8] sm:$0xff] }
0x126f   :  { %2143 = vmatprep.subr.bf16.mxu1 %v2427_v51  ;;  %v2432_v51 = vcombine.low %v1921_v46, %v1925_v47 }
0x1272   :  { %2144 = vmatpush1.bf16.msra.mxu1 %v2426_v54  ;;  %v1954_v54 = vsub.s32 4, %v3290_v16 }
0x133c   :  { %v1733_v12 = vpop.f32.mrb[48].mxu1 }
0x133d   :  { %v1734_v1 = vadd.f32 %v2393_v63, %v1733_v12  ;;  %v2662_v2 = vpop.f32.mrb[49].mxu1  ;;  %v1903_v12 = vld [vmem:[#allocation18 + $0x8] sm:$0xff] }
0x133e   :  { %v1736_v3 = vpop.f32.mrb[50].mxu1 }
0x133f   :  { %v1737_v28 = vadd.f32 %v2393_v63, %v1736_v3  ;;  %v2663_v5 = vpop.f32.mrb[51].mxu1  ;;  %v1740_v4 = vmax.f32 %v1734_v1, 0.0  ;;  %v1932_v63 = vld [vmem:[#allocation18 + $0xf0] sm:$0xff]  ;;  %v1907_v1 = vld [vmem:[#allocation18 + $0x28] sm:$0xff] }
0x1340   :  { %v2438_v2 = vcombine.low %v1928_v59, %v1932_v63  ;;  %v2439_v3 = vcombine.high %v1928_v59, %v1932_v63  ;;  %v2413_v5 = vcombine.high %v1903_v12, %v1907_v1 }
0x1341   :  { %v1741_v6 = vmax.f32 %v1737_v28, 0.0  ;;  %v2412_v28 = vcombine.low %v1903_v12, %v1907_v1 }
0x1343   :  { %v1742_v7 = vpack.c.bf16 %v1741_v6, %v1740_v4 }
0x1345   :  { %2681 = vmatmul.mubr.bf16.vlgmr.msra.gmra.mrb[28].mxu0 %v1742_v7 }
0x1346   :  { %2257 = vmatprep.mubr.bf16.mxu0 %v3052_v0  ;;  %2226 = vmatpush1.bf16.msra.mxu0 %v2414_v42  ;;  %v2417_v42 = vcombine.high %v1905_v39, %v1909_v40 }
0x1347   :  { %2227 = vmatprep.subr.bf16.mxu0 %v2423_v48  ;;  %v2424_v48 = vcombine.low %v1913_v60, %v1917_v43 }
0x134a   :  { %2228 = vmatpush1.bf16.msra.mxu0 %v2422_v49  ;;  %v2433_v49 = vcombine.high %v1921_v46, %v1925_v47 }
0x134b   :  { %2229 = vmatprep.subr.bf16.mxu0 %v2431_v55  ;;  %v1958_v55 = vsub.s32 5, %v3290_v16 }
0x134e   :  { %2230 = vmatpush1.bf16.msra.mxu0 %v2430_v56 }
0x134f   :  { %2231 = vmatprep.subr.bf16.mxu0 %v2439_v3 }
0x1352   :  { %2232 = vmatpush1.bf16.msra.mxu0 %v2438_v2 }
0x1418   :  { %v1848_v17 = vpop.f32.mrb[28].mxu0 }
0x1419   :  { %v1849_v9 = vadd.f32 %v2399_v8, %v1848_v17  ;;  %v2682_v10 = vpop.f32.mrb[29].mxu0 }
0x141a   :  { %v1851_v11 = vpop.f32.mrb[30].mxu0 }
0x141b   :  { %v1852_v14 = vadd.f32 %v2399_v8, %v1851_v11  ;;  %v2683_v37 = vpop.f32.mrb[31].mxu0  ;;  %v1855_v15 = vadd.f32 %v1849_v9, %v1654_v57  ;;  %v1926_v57 = vld [vmem:[#allocation18 + $0xc0] sm:$0xff] }
0x141d   :  { %v1859_v19 = vsel %vm231_vm0, %v1855_v15, 0.0  ;;  %v1856_v21 = vadd.f32 %v1852_v14, %v1655_v58  ;;  %v1930_v58 = vld [vmem:[#allocation18 + $0xe0] sm:$0xff]  ;;  %v2408_v14 = vld [vmem:[%s3626_s12] ss:$0 sm:$0xff] }
0x141e   :  { %1860 = vadd.xlane.f32.xlu1 %v1859_v19  ;;  %v2434_v61 = vcombine.low %v1926_v57, %v1930_v58  ;;  %v2435_v62 = vcombine.high %v1926_v57, %v1930_v58 }
0x141f   :  { %v1862_v22 = vsel %vm231_vm0, %v1856_v21, 0.0 }
0x1420   :  { %2145 = vmatprep.subr.bf16.mxu1 %v2435_v62 }
0x1421   :  { %2146 = vmatpush1.bf16.msra.mxu1 %v2434_v61 }
0x1422   :  { %1863 = vadd.xlane.f32.xlu1 %v1862_v22  ;;  %2182 = vmatprep.subr.bf16.mxu1 %v2413_v5 }
0x14ab   :  { %v1861_v23 = vpop.xlane.xlu1 %1860 }
0x14ac   :  { %v1865_v24 = vmul.f32 0.015625, %v1861_v23  ;;  %v1911_v23 = vld [vmem:[#allocation18 + $0x48] sm:$0xff] }
0x14ae   :  { %v3564_v25 = vsub.f32 %v1855_v15, %v1865_v24  ;;  %v1915_v24 = vld [vmem:[#allocation18 + $0x68] sm:$0xff] }
0x14af   :  { %v1864_v26 = vpop.xlane.xlu1 %1863 }
0x14b0   :  { %v1866_v27 = vmul.f32 0.015625, %v1864_v26  ;;  %v1869_v29 = vmul.f32 %v3564_v25, %v3564_v25 }
0x14b2   :  { %v3568_v31 = vsub.f32 %v1856_v21, %v1866_v27  ;;  %v1871_v32 = vsel %vm231_vm0, %v1869_v29, 0.0  ;;  %v2409_v21 = vld [vmem:[%s3627_s13] ss:$0 sm:$0xff] }
0x14b3   :  { %1872 = vadd.xlane.f32.xlu0 %v1871_v32  ;;  %v2421_v32 = vcombine.high %v1911_v23, %v1915_v24 }
0x14b4   :  { %v1870_v33 = vmul.f32 %v3568_v31, %v3568_v31 }
0x14b6   :  { %v1874_v34 = vsel %vm231_vm0, %v1870_v33, 0.0  ;;  %v1923_v33 = vld [vmem:[#allocation18 + $0xa8] sm:$0xff] }
0x14b7   :  { %1875 = vadd.xlane.f32.xlu1 %v1874_v34  ;;  %v2420_v34 = vcombine.low %v1911_v23, %v1915_v24 }
0x1540   :  { %v1873_v4 = vpop.xlane.xlu0 %1872 }
0x1541   :  { %v1877_v6 = vmul.f32 0.015625, %v1873_v4 }
0x1543   :  { %v1879_v7 = vadd.f32 1e-05, %v1877_v6 }
0x1544   :  { %v1876_v8 = vpop.xlane.xlu1 %1875 }
0x1545   :  { %2801 = vrsqrt.f32 %v1879_v7  ;;  %v1878_v17 = vmul.f32 0.015625, %v1876_v8 }
0x1547   :  { %v1880_v9 = vadd.f32 1e-05, %v1878_v17 }
0x1549   :  { %2803 = vrsqrt.f32 %v1880_v9  ;;  %v1946_v9 = vsub.s32 2, %v3290_v16 }
0x154f   :  { %v2802_v10 = vpop.eup %2801 }
0x1550   :  { %v1883_v11 = vmul.f32 %v2802_v10, %v3564_v25  ;;  %v1919_v25 = vld [vmem:[#allocation18 + $0x88] sm:$0xff]  ;;  %v1950_v10 = vsub.s32 3, %v3290_v16 }
0x1551   :  { %v2428_v13 = vcombine.low %v1919_v25, %v1923_v33 }
0x1552   :  { %v1891_v15 = vmul.f32 %v2408_v14, %v1883_v11 }
0x1553   :  { %v2804_v37 = vpop.eup %2803 }
0x1554   :  { %v1884_v19 = vmul.f32 %v2804_v37, %v3568_v31  ;;  %v1899_v26 = vadd.f32 %v2409_v21, %v1891_v15  ;;  %v2429_v31 = vcombine.high %v1919_v25, %v1923_v33 }
0x1556   :  { %v1892_v22 = vmul.f32 %v2408_v14, %v1884_v19 }
0x1558   :  { %v1900_v27 = vadd.f32 %v2409_v21, %v1892_v22 }
0x155a   :  { %v1901_v29 = vpack.c.bf16 %v1900_v27, %v1899_v26  ;;  %v1962_v27 = vsub.s32 6, %v3290_v16 }
0x155c   :  { %2442 = vmatmul.mubr.msk.bf16.vlgmr.msra.gmra.mrb[52].mxu1 %vm231_vm0, %v1901_v29  ;;  %2444 = vmatmul.mubr.msk.bf16.vlgmr.msra.gmra.mrb[32].mxu0 %vm231_vm0, %v1901_v29 }
0x155d   :  { %2183 = vmatpush1.bf16.msra.mxu1 %v2412_v28  ;;  %2214 = vmatprep.mubr.bf16.mxu1 %v3052_v0 }
0x155e   :  { %2184 = vmatprep.subr.bf16.mxu1 %v2421_v32 }
0x1561   :  { %2185 = vmatpush1.bf16.msra.mxu1 %v2420_v34 }
0x1562   :  { %2186 = vmatprep.subr.bf16.mxu1 %v2429_v31 }
0x1565   :  { %2187 = vmatpush1.bf16.msra.mxu1 %v2428_v13 }
0x1566   :  { %2188 = vmatprep.subr.bf16.mxu1 %v2437_v38 }
0x1569   :  { %2189 = vmatpush1.bf16.msra.mxu1 %v2436_v41 }
0x156a   :  { %2268 = vmatprep.subr.bf16.mxu1 %v2417_v42 }
0x156c   :  { %2443 = vmatmul.mubr.msk.bf16.vlgmr.msra.gmra.mrb[56].mxu1 %vm231_vm0, %v1901_v29 }
0x156d   :  { %2269 = vmatpush1.bf16.msra.mxu1 %v2416_v44  ;;  %2300 = vmatprep.mubr.bf16.mxu1 %v3052_v0  ;;  %v1934_v0 = vld [vmem:[%s3629_s15] sm:$0xff]  ;;  %s3060_s15 = smov [#allocation19]  }
0x156e   :  { %2270 = vmatprep.subr.bf16.mxu1 %v2425_v45  ;;  %v1939_v56 = vrot.slane %v1934_v0, %v183_v18  ;;  %v1955_v57 = vrot.slane %v1934_v0, %v1954_v54  ;;  %v1943_v58 = vrot.slane %v1934_v0, %v187_v20  ;;  %v1959_v59 = vrot.slane %v1934_v0, %v1958_v55  ;;  %s2332_s28 = sshll.u32 %s3060_s15, 4  ;;  %s2333_s28 = int_to_ptr.vmem [resolvable:$true] %s2332_s28 }
0x156f   :  { %v1947_v11 = vrot.slane %v1934_v0, %v1946_v9  ;;  %v1951_v14 = vrot.slane %v1934_v0, %v1950_v10  ;;  %v1963_v32 = vrot.slane %v1934_v0, %v1962_v27  ;;  %s3003_s29 = scalar_lea.vmem %s2333_s28, 2048  ;;  %p3008_p3 = scmp.lt.s32.totalorder %s2333_s28, %s2333_s28 }
0x1570   :  { %p3004_p2 = scmp.ne.s32.totalorder %s2333_s28, %s3003_s29  ;;  %p3009_p4 = scmp.lt.s32.totalorder %s3003_s29, %s3003_s29 }
0x1571   :  { %2271 = vmatpush1.bf16.msra.mxu1 %v2424_v48 }
0x1572   :  { %2272 = vmatprep.subr.bf16.mxu1 %v2433_v49  ;;  %p3010_p5 = por %p3009_p4, %p3008_p3 }
0x1574   :  { %p3011_p6 = pnand %p3010_p5, %p3004_p2 }
0x1575   :  { %2273 = vmatpush1.bf16.msra.mxu1 %v2432_v51 }
0x1576   :  { %2274 = vmatprep.subr.bf16.mxu1 %v2441_v52 }
0x1579   :  { %2275 = vmatpush1.bf16.msra.mxu1 %v2440_v53 }
0x157c   :  { %2445 = vmatmul.mubr.msk.bf16.vlgmr.msra.gmra.mrb[60].mxu1 %vm231_vm0, %v1901_v29  ;;  %v1966_v29 = vsub.s32 7, %v3290_v16 }
0x157e   :  { %v1967_v25 = vrot.slane %v1934_v0, %v1966_v29 }
0x162f   :  { %v2173_v61 = vpop.f32.mrb[52].mxu1  ;;  %v2259_v62 = vpop.f32.mrb[32].mxu0 }
0x1630   :  { %v2174_v63 = vadd.f32 %v2173_v61, %v1939_v56  ;;  %v2260_v12 = vadd.f32 %v2259_v62, %v1955_v57  ;;  %v2175_v1 = vpop.f32.mrb[53].mxu1  ;;  %v2261_v2 = vpop.f32.mrb[33].mxu0 }
0x1631   :  { %v2176_v3 = vadd.f32 %v2175_v1, %v1943_v58  ;;  %v2262_v28 = vadd.f32 %v2261_v2, %v1959_v59  ;;  %v2177_v5 = vpop.f32.mrb[54].mxu1  ;;  %v2263_v4 = vpop.f32.mrb[34].mxu0 }
0x1632   :  { %2311 = vst [vmem:[#allocation19] sm:$0xff] %v2174_v63  ;;  %2315 = vst [vmem:[#allocation19 + $0x20] sm:$0xff] %v2260_v12  ;;  %v2178_v6 = vadd.f32 %v2177_v5, %v1939_v56  ;;  %v2264_v7 = vadd.f32 %v2263_v4, %v1955_v57  ;;  %v2179_v18 = vpop.f32.mrb[55].mxu1  ;;  %v2265_v8 = vpop.f32.mrb[35].mxu0 }
0x1633   :  { %2312 = vst [vmem:[#allocation19 + $0x8] sm:$0xff] %v2176_v3  ;;  %2316 = vst [vmem:[#allocation19 + $0x28] sm:$0xff] %v2262_v28  ;;  %v2180_v20 = vadd.f32 %v2179_v18, %v1943_v58  ;;  %v2266_v17 = vadd.f32 %v2265_v8, %v1959_v59 }
0x1634   :  { %2319 = vst [vmem:[#allocation19 + $0x40] sm:$0xff] %v2178_v6  ;;  %2323 = vst [vmem:[#allocation19 + $0x60] sm:$0xff] %v2264_v7 }
0x1635   :  { %2320 = vst [vmem:[#allocation19 + $0x48] sm:$0xff] %v2180_v20  ;;  %2324 = vst [vmem:[#allocation19 + $0x68] sm:$0xff] %v2266_v17 }
0x163f   :  { %v2216_v37 = vpop.f32.mrb[56].mxu1 }
0x1640   :  { %v2217_v15 = vadd.f32 %v2216_v37, %v1947_v11  ;;  %v2218_v19 = vpop.f32.mrb[57].mxu1 }
0x1641   :  { %v2219_v21 = vadd.f32 %v2218_v19, %v1951_v14  ;;  %v2220_v22 = vpop.f32.mrb[58].mxu1 }
0x1642   :  { %2313 = vst [vmem:[#allocation19 + $0x10] sm:$0xff] %v2217_v15  ;;  %v2221_v23 = vadd.f32 %v2220_v22, %v1947_v11  ;;  %v2222_v24 = vpop.f32.mrb[59].mxu1 }
0x1643   :  { %2314 = vst [vmem:[#allocation19 + $0x18] sm:$0xff] %v2219_v21  ;;  %v2223_v26 = vadd.f32 %v2222_v24, %v1951_v14 }
0x1644   :  { %2321 = vst [vmem:[#allocation19 + $0x50] sm:$0xff] %v2221_v23 }
0x1645   :  { %2322 = vst [vmem:[#allocation19 + $0x58] sm:$0xff] %v2223_v26 }
0x164f   :  { %v2302_v33 = vpop.f32.mrb[60].mxu1 }
0x1650   :  { %v2303_v34 = vadd.f32 %v2302_v33, %v1963_v32  ;;  %v2304_v31 = vpop.f32.mrb[61].mxu1 }
0x1651   :  { %v2305_v35 = vadd.f32 %v2304_v31, %v1967_v25  ;;  %v2306_v36 = vpop.f32.mrb[62].mxu1 }
0x1652   :  { %2317 = vst [vmem:[#allocation19 + $0x30] sm:$0xff] %v2303_v34  ;;  %v2307_v13 = vadd.f32 %v2306_v36, %v1963_v32  ;;  %v2308_v38 = vpop.f32.mrb[63].mxu1 }
0x1653   :  { %2318 = vst [vmem:[#allocation19 + $0x38] sm:$0xff] %v2305_v35  ;;  %v2309_v39 = vadd.f32 %v2308_v38, %v1967_v25 }
0x1654   :  { %2325 = vst [vmem:[#allocation19 + $0x70] sm:$0xff] %v2307_v13 }
0x1655   :  { %2326 = vst [vmem:[#allocation19 + $0x78] sm:$0xff] %v2309_v39 }
0x1656   :  { %3014 = shalt.err (!%p3011_p6)
}
0x1657   :  { %s3015_s5 = scalar_lea.hbm %s3630_s16, 2048 }
0x1658   :  { %p3016_p7 = scmp.ne.s32.totalorder %s3630_s16, %s3015_s5  ;;  %p3019_p8 = scmp.lt.u32.totalorder %s3015_s5, %s3630_s16 }
0x165a   :  { %p3021_p9 = pnand %p3019_p8, %p3016_p7 }
0x165c   :  { %3024 = shalt.err (!%p3021_p9)
}
0x165d   :  { %s3061_s20 = smov 1024  }
0x165e   :  { %2338 = dma.vmem_to_hbm [thread:$0]  %s2333_s28, 2048, %s3630_s16, [#allocation6], %s3061_s20, %s3061_s20, %s3040_s6  }
0x165f   :  { %3035 = dma.done.wait [#allocation6], 2048  }
0x1660   :  { %3036 = vsyncadd [#allocation6], 4294965248 }
0x1661   :  { %2342 = vsyncpa [#allocation5], 1 }
0x1662   :  { %2343 = vsyncpa [#allocation8], 1 }
0x1663   :  { %2344 = vsyncpa [#allocation11], 1 }
0x1664   :  { %2345 = vsyncpa [#allocation14], 1 }
0x1665   :  { %2346 = vsyncpa [#allocation17], 1 }
0x1666   :  { %2347 = vsyncpa [#allocation6], 1 }

</bundles_post_ra>
